<compile_context>
chip_gen: v6e
topology: v6e:2x2x1
jax: 0.10.0
libtpu: 0.0.40
codegen_flags: <defaults>
</compile_context>

<pallas_src>
import jax
import jax.numpy as jnp
from jax.experimental import pallas as pl
from jax.experimental.pallas import tpu as pltpu

C_FEAT = 64      # history_backbone_config.final_feature_size
HIDDEN = 32      # p2_backbone hidden width
P_DIM = 4        # preserved point columns [bs_idx, x, y, z]
OUT_W = 128      # packed lane-dense output: [ofield(64) | p2(1) | zeros(63)]

_KEY_BASE = 65536   # (a, b) -> a*2^16 + b, injective for values in a 16-bit window
_SENT = 1.0e30      # match-accumulator sentinel (|hraw| assumed << 1e30)


# ----------------------------------------------------------------------------
# Fused kernel: collapsed history max-pool at query coords -> backbone-channel
# reconstruction -> kernel_size=1 current_conv + p2 MLP (single fused MXU dot).
# grid = (query tiles [parallel], history tiles [reduction, last]).
# ----------------------------------------------------------------------------
def _fused_kernel(qk_ref, hk_ref, hraw_ref, wbb_ref, bbb_ref, wbig_ref,
                  hpts_ref, w2_ref, b2_ref, out_ref, acc_ref):
    j = pl.program_id(1)

    @pl.when(j == 0)
    def _init():
        # col 0: running max of matched hraw; col 1: running max of -hraw.
        acc_ref[...] = jnp.full(acc_ref.shape, -_SENT, jnp.float32)

    # --- collapsed MinkowskiMaxPooling over history at query coordinates ----
    # mask is generated in its consumed orientation (query=sublane, hist=lane):
    # no relayout, and the reduction over history is a cheap lane (XLU) reduce.
    match = ((qk_ref[:, 0:1] == hk_ref[0:1, :]) &
             (qk_ref[:, 1:2] == hk_ref[1:2, :]))                   # (tq, th)
    hrow = hraw_ref[...]                                           # (1, th) f32
    mx = jnp.max(jnp.where(match, hrow, -_SENT), axis=1, keepdims=True)
    mn = jnp.max(jnp.where(match, -hrow, -_SENT), axis=1, keepdims=True)
    acc_ref[...] = jnp.maximum(acc_ref[...],
                               jnp.concatenate([mx, mn], axis=1))  # (tq, 2)

    # --- heads: once per query tile, after the last history tile -------------
    @pl.when(j == pl.num_programs(1) - 1)
    def _finish():
        rmax = acc_ref[:, 0:1]                                     # (tq, 1)
        rmin = -acc_ref[:, 1:2]
        any_match = rmax > (-0.5 * _SENT)
        wbb, bbb = wbb_ref[...], bbb_ref[...]                      # (1, C)
        # max over matched h of ReLU(hraw*w + b) = ReLU(max(rmax*w, rmin*w) + b)
        pre = jnp.maximum(rmax * wbb, rmin * wbb) + bbb            # (tq, C) f32
        pooled = jnp.where(any_match, jnp.maximum(pre, 0.0), 0.0)  # no match -> 0

        # one fused MXU dot: [ofield | h_pre] = pooled @ [w_conv | w_conv@w1f]
        big = jnp.dot(pooled.astype(jnp.bfloat16), wbig_ref[...],
                      preferred_element_type=jnp.float32)          # (tq, C+HID)
        ofield = big[:, :C_FEAT]                                   # current_conv(k=1)
        # p2_backbone: feature half from the fused dot; point half (pts4@w1p+b1)
        # arrives pre-computed (exact f32, folded into the wrapper padding op).
        h = jnp.maximum(big[:, C_FEAT:] + hpts_ref[...], 0.0)      # (tq, HIDDEN)
        # second layer has N=1: VPU multiply + lane reduction instead of MXU
        logit = jnp.sum(h * w2_ref[...], axis=1, keepdims=True) + b2_ref[...]
        p2 = 1.0 / (1.0 + jnp.exp(-logit))

        # single lane-dense (tq, 128) store: [ofield | p2 | zero pad]
        pad = jnp.zeros((ofield.shape[0], OUT_W - C_FEAT - 1), jnp.float32)
        out_ref[...] = jnp.concatenate([ofield, p2, pad], axis=1)


# ----------------------------------------------------------------------------
# Glue
# ----------------------------------------------------------------------------
def _round_up(n, m):
    return ((n + m - 1) // m) * m


def _cdiv(a, b):
    return (a + b - 1) // b


def _pack_keys(b, x, y, z):
    """Pack (batch, x, y, z) into two int32 keys, shape (2, N)."""
    return jnp.stack([b * _KEY_BASE + x, y * _KEY_BASE + z], axis=0)


def init_params(key):
    ks = jax.random.split(key, 8)
    return dict(
        w_bb=0.5 * jax.random.normal(ks[0], (1, C_FEAT), jnp.float32),
        b_bb=0.1 * jax.random.normal(ks[1], (1, C_FEAT), jnp.float32),
        w_conv=jax.random.normal(ks[2], (C_FEAT, C_FEAT), jnp.float32) / jnp.sqrt(C_FEAT),
        # Linear(68, 32) stored split: point part (4, 32) + feature part (64, 32)
        w1p=jax.random.normal(ks[3], (P_DIM, HIDDEN), jnp.float32) / jnp.sqrt(P_DIM + C_FEAT),
        w1f=jax.random.normal(ks[4], (C_FEAT, HIDDEN), jnp.float32) / jnp.sqrt(P_DIM + C_FEAT),
        b1=0.1 * jax.random.normal(ks[5], (1, HIDDEN), jnp.float32),
        w2=jax.random.normal(ks[6], (1, HIDDEN), jnp.float32) / jnp.sqrt(HIDDEN),  # row form
        b2=0.1 * jax.random.normal(ks[7], (1, 1), jnp.float32),
    )


def sparse_resu_query_net_forward(params, batch, *, tq=256, th=1024):
    """After the algebraic collapse the per-step working set is ~2 MiB, so the
    same tq/th defaults fit v5e/v6e (128 MiB VMEM) and v7x (64 MiB/TC); for
    production Nh, th can be raised further on v5e/v6e."""
    hist_feat = batch['history_features'].astype(jnp.float32)          # [Nh, 1]
    hist_coord = batch['history_coordinates'].astype(jnp.int32)        # [Nh, 4] = [scan, x, y, z]
    hist_batch = batch['history_batches'].astype(jnp.int32)            # [Nh]
    curr_coord = batch['current_scan_coordinates'].astype(jnp.int32)   # [Nq, 4] = [b, x, y, z]
    points = batch['points'].astype(jnp.float32)                       # [Nq, >=4]

    nq, nh = curr_coord.shape[0], hist_coord.shape[0]

    # Query tile: shrink to (8-aligned) problem size; keep >= 2 query blocks
    # when possible so both v7x TensorCores get parallel i-blocks.
    tq = min(tq, _round_up(nq, 8))
    if _cdiv(nq, tq) < 2 and tq >= 16:
        tq = _round_up(_cdiv(tq, 2), 8)
    nq_pad = _round_up(nq, tq)                 # recomputed AFTER the adjustment
    # History tile: keep the lane axis 128-aligned (dense vst/vld, no edge tiles).
    th = min(th, _round_up(nh, 128))
    nh_pad = _round_up(nh, th)

    # Packed coordinate keys.  Padding sentinels are outside the reachable key0
    # range of real points (batch >= 0, |coords| <= 32767 -> key0 >= -32767),
    # so padded rows can never match real rows (both keys must agree).
    qkeys = _pack_keys(curr_coord[:, 0], curr_coord[:, 1],
                       curr_coord[:, 2], curr_coord[:, 3]).T           # (Nq, 2)
    hkeys = _pack_keys(hist_batch, hist_coord[:, 1],
                       hist_coord[:, 2], hist_coord[:, 3])             # (2, Nh)
    qkeys = jnp.pad(qkeys, ((0, nq_pad - nq), (0, 0)), constant_values=-_KEY_BASE)
    hkeys = jnp.pad(hkeys, ((0, 0), (0, nh_pad - nh)), constant_values=-2 * _KEY_BASE)
    # history raw features transposed to (1, nh_pad): lane-dense per-j DMA.
    hraw = jnp.pad(hist_feat.reshape(1, -1), ((0, 0), (0, nh_pad - nh)))

    # Epilogue fusion: ofield = pooled @ w_conv and the feature half of the p2
    # first layer share the same LHS -> one (64, 96) RHS for a single MXU dot.
    w_big = jnp.concatenate(
        [params['w_conv'], params['w_conv'] @ params['w1f']], axis=1).astype(jnp.bfloat16)
    # Degenerate K=4 point half of Linear(68,32): exact f32, fused by XLA with
    # the padding op here instead of 4 serialized in-kernel MACs.
    h_pts = points[:, :P_DIM] @ params['w1p'] + params['b1']           # (Nq, HIDDEN)
    h_pts = jnp.pad(h_pts, ((0, nq_pad - nq), (0, 0)))

    grid = (nq_pad // tq, nh_pad // th)

    packed = pl.pallas_call(
        _fused_kernel,
        out_shape=jax.ShapeDtypeStruct((nq_pad, OUT_W), jnp.float32),
        grid=grid,
        in_specs=[
            pl.BlockSpec((tq, 2), lambda i, j: (i, 0)),                  # query keys
            pl.BlockSpec((2, th), lambda i, j: (0, j)),                  # history keys
            pl.BlockSpec((1, th), lambda i, j: (0, j)),                  # raw history feats (row)
            pl.BlockSpec((1, C_FEAT), lambda i, j: (0, 0)),              # w_bb
            pl.BlockSpec((1, C_FEAT), lambda i, j: (0, 0)),              # b_bb
            pl.BlockSpec((C_FEAT, C_FEAT + HIDDEN), lambda i, j: (0, 0)),  # [w_conv | w_conv@w1f]
            pl.BlockSpec((tq, HIDDEN), lambda i, j: (i, 0)),             # pts4@w1p + b1
            pl.BlockSpec((1, HIDDEN), lambda i, j: (0, 0)),              # w2 (row)
            pl.BlockSpec((1, 1), lambda i, j: (0, 0)),                   # b2
        ],
        out_specs=pl.BlockSpec((tq, OUT_W), lambda i, j: (i, 0)),
        scratch_shapes=[pltpu.VMEM((tq, 2), jnp.float32)],               # [rmax | max(-r)]
        compiler_params=pltpu.CompilerParams(
            dimension_semantics=("parallel", "arbitrary"),
            vmem_limit_bytes=32 * 1024 * 1024),
    )(qkeys, hkeys, hraw, params['w_bb'], params['b_bb'], w_big,
      h_pts, params['w2'], params['b2'])

    ofield = packed[:nq, :C_FEAT]
    p2_pred = packed[:nq, C_FEAT:C_FEAT + 1]

    out = dict(batch)
    # mode == 'update_point_features', preserve_feature == 3 -> points[:, :4]
    out['points'] = jnp.concatenate([points[:, :P_DIM], ofield], axis=1)
    out['p2_pred'] = p2_pred
    return out


def _reference(params, batch):
    """Pure-JAX float32 reference of the same semantics (for validation)."""
    hist_feat = batch['history_features'].astype(jnp.float32)
    hist_coord = batch['history_coordinates'].astype(jnp.int32)
    hist_batch = batch['history_batches'].astype(jnp.int32)
    curr_coord = batch['current_scan_coordinates'].astype(jnp.int32)
    points = batch['points'].astype(jnp.float32)

    hf = jnp.maximum(hist_feat @ params['w_bb'] + params['b_bb'], 0.0)
    qk = _pack_keys(curr_coord[:, 0], curr_coord[:, 1], curr_coord[:, 2], curr_coord[:, 3])
    hk = _pack_keys(hist_batch, hist_coord[:, 1], hist_coord[:, 2], hist_coord[:, 3])
    match = (qk[0][:, None] == hk[0][None, :]) & (qk[1][:, None] == hk[1][None, :])
    masked = jnp.where(match[:, :, None], hf[None, :, :], -jnp.inf)
    pooled = masked.max(axis=1)
    pooled = jnp.where(jnp.isfinite(pooled), pooled, 0.0)   # no-match -> 0 (conv has no bias)
    ofield = pooled @ params['w_conv']
    pts = jnp.concatenate([points[:, :P_DIM], ofield], axis=1)
    h = jnp.maximum(pts[:, :P_DIM] @ params['w1p'] + ofield @ params['w1f'] + params['b1'], 0.0)
    p2 = jax.nn.sigmoid(h @ params['w2'].T + params['b2'])
    return pts, p2


if __name__ == "__main__":
    key = jax.random.PRNGKey(0)
    k_q, k_scan, k_rand, k_feat, k_int, k_par = jax.random.split(key, 6)

    Nq, Nh, B = 250, 500, 2   # deliberately not tile-aligned: exercises padding

    # current scan: [batch, x, y, z]
    q_b = (jnp.arange(Nq) % B).astype(jnp.int32)
    q_xyz = jax.random.randint(k_q, (Nq, 3), 0, 16, dtype=jnp.int32)
    current_scan_coordinates = jnp.concatenate([q_b[:, None], q_xyz], axis=1)

    # history: [scan_idx, x, y, z] + separate real-batch index.  First Nq
    # history points sit exactly on the query voxels (so the pool finds them).
    h_scan = jax.random.randint(k_scan, (Nh, 1), 0, 4, dtype=jnp.int32)
    rand_xyz = jax.random.randint(k_rand, (Nh, 3), 0, 16, dtype=jnp.int32)
    h_xyz = jnp.concatenate([q_xyz, rand_xyz[Nq:]], axis=0)
    h_batch = jnp.concatenate([q_b, (jnp.arange(Nh - Nq) % B).astype(jnp.int32)], axis=0)
    history_coordinates = jnp.concatenate([h_scan, h_xyz], axis=1)
    history_features = jax.random.normal(k_feat, (Nh, 1), jnp.float32)

    # raw points: [bs_idx, x, y, z, intensity]
    intensity = jax.random.uniform(k_int, (Nq, 1), jnp.float32)
    points = jnp.concatenate(
        [q_b[:, None].astype(jnp.float32), q_xyz.astype(jnp.float32) * 0.1, intensity], axis=1)

    batch = dict(
        history_features=history_features,
        history_coordinates=history_coordinates,
        history_batches=h_batch,
        current_scan_coordinates=current_scan_coordinates,
        points=points,
    )

    params = init_params(k_par)

    out = sparse_resu_query_net_forward(params, batch)
    pts = jax.block_until_ready(out['points'])
    p2 = jax.block_until_ready(out['p2_pred'])

    ref_pts, ref_p2 = _reference(params, batch)
    assert pts.shape == (Nq, P_DIM + C_FEAT) and p2.shape == (Nq, 1)
    assert bool(jnp.all(jnp.isfinite(pts))) and bool(jnp.all(jnp.isfinite(p2)))
    assert bool(jnp.allclose(pts, ref_pts, rtol=5e-2, atol=5e-2))
    assert bool(jnp.allclose(p2, ref_p2, rtol=5e-2, atol=5e-2))

    print("KERNEL_OK")
</pallas_src>

<mosaic_0001>
module attributes {stable_mosaic.version = 11 : i64} {
  func.func @_fused_kernel(%arg0: i32, %arg1: i32, %arg2: memref<128x2xi32, #tpu.memory_space<vmem>>, %arg3: memref<2x512xi32, #tpu.memory_space<vmem>>, %arg4: memref<1x512xf32, #tpu.memory_space<vmem>>, %arg5: memref<1x64xf32, #tpu.memory_space<vmem>>, %arg6: memref<1x64xf32, #tpu.memory_space<vmem>>, %arg7: memref<64x96xbf16, #tpu.memory_space<vmem>>, %arg8: memref<128x32xf32, #tpu.memory_space<vmem>>, %arg9: memref<1x32xf32, #tpu.memory_space<vmem>>, %arg10: memref<1x1xf32, #tpu.memory_space<vmem>>, %arg11: memref<128x128xf32, #tpu.memory_space<vmem>>, %arg12: memref<128x2xf32, #tpu.memory_space<vmem>>) attributes {dimension_semantics = [#tpu.dimension_semantics<parallel>, #tpu.dimension_semantics<arbitrary>], iteration_bounds = array<i64: 2, 1>, scalar_prefetch = 0 : i64, scratch_operands = 1 : i64, tpu.core_type = #tpu.core_type<tc>, window_params = [{transform_indices = @transform_0, window_bounds = array<i64: 128, 2>}, {transform_indices = @transform_1, window_bounds = array<i64: 2, 512>}, {transform_indices = @transform_2, window_bounds = array<i64: 1, 512>}, {pipeline_mode = #tpu.pipeline_mode<synchronous>, transform_indices = @transform_3, window_bounds = array<i64: 1, 64>}, {pipeline_mode = #tpu.pipeline_mode<synchronous>, transform_indices = @transform_4, window_bounds = array<i64: 1, 64>}, {pipeline_mode = #tpu.pipeline_mode<synchronous>, transform_indices = @transform_5, window_bounds = array<i64: 64, 96>}, {transform_indices = @transform_6, window_bounds = array<i64: 128, 32>}, {pipeline_mode = #tpu.pipeline_mode<synchronous>, transform_indices = @transform_7, window_bounds = array<i64: 1, 32>}, {pipeline_mode = #tpu.pipeline_mode<synchronous>, transform_indices = @transform_8, window_bounds = array<i64: 1, 1>}, {transform_indices = @transform_9, window_bounds = array<i64: 128, 128>}]} {
    %c0_i32 = arith.constant 0 : i32
    %0 = arith.cmpi eq, %arg1, %c0_i32 : i32
    %1 = arith.extui %0 : i1 to i32
    %c0_i32_0 = arith.constant 0 : i32
    %2 = arith.cmpi ne, %1, %c0_i32_0 : i32
    scf.if %2 {
      %cst_19 = arith.constant -1.000000e+30 : f32
      %36 = vector.broadcast %cst_19 : f32 to vector<128x2xf32>
      %c0_20 = arith.constant 0 : index
      %c0_21 = arith.constant 0 : index
      %37 = vector.load %arg12[%c0_20, %c0_21] : memref<128x2xf32, #tpu.memory_space<vmem>>, vector<128x2xf32>
      tpu.vector_store %arg12[%c0_20, %c0_21], %36 {strides = array<i32>} : memref<128x2xf32, #tpu.memory_space<vmem>>, vector<128x2xf32>,
    } else {
    }
    %c0 = arith.constant 0 : index
    %c0_1 = arith.constant 0 : index
    %3 = vector.load %arg2[%c0, %c0_1] : memref<128x2xi32, #tpu.memory_space<vmem>>, vector<128x1xi32>
    %c0_2 = arith.constant 0 : index
    %c0_3 = arith.constant 0 : index
    %4 = vector.load %arg3[%c0_2, %c0_3] : memref<2x512xi32, #tpu.memory_space<vmem>>, vector<1x512xi32>
    %5 = vector.broadcast %3 : vector<128x1xi32> to vector<128x512xi32>
    %6 = vector.broadcast %4 : vector<1x512xi32> to vector<128x512xi32>
    %7 = arith.cmpi eq, %5, %6 : vector<128x512xi32>
    %c0_4 = arith.constant 0 : index
    %c1 = arith.constant 1 : index
    %8 = vector.load %arg2[%c0_4, %c1] : memref<128x2xi32, #tpu.memory_space<vmem>>, vector<128x1xi32>
    %c1_5 = arith.constant 1 : index
    %c0_6 = arith.constant 0 : index
    %9 = vector.load %arg3[%c1_5, %c0_6] : memref<2x512xi32, #tpu.memory_space<vmem>>, vector<1x512xi32>
    %10 = vector.broadcast %8 : vector<128x1xi32> to vector<128x512xi32>
    %11 = vector.broadcast %9 : vector<1x512xi32> to vector<128x512xi32>
    %12 = arith.cmpi eq, %10, %11 : vector<128x512xi32>
    %13 = arith.andi %7, %12 : vector<128x512xi1>
    %c0_7 = arith.constant 0 : index
    %c0_8 = arith.constant 0 : index
    %14 = vector.load %arg4[%c0_7, %c0_8] : memref<1x512xf32, #tpu.memory_space<vmem>>, vector<1x512xf32>
    %cst = arith.constant -1.000000e+30 : f32
    %15 = vector.shape_cast %14 : vector<1x512xf32> to vector<1x512xf32>
    %16 = vector.broadcast %15 : vector<1x512xf32> to vector<128x512xf32>
    %17 = vector.broadcast %cst : f32 to vector<128x512xf32>
    %18 = arith.select %13, %16, %17 : vector<128x512xi1>, vector<128x512xf32>
    %cst_9 = arith.constant dense<0xFF800000> : vector<128xf32>
    %19 = vector.multi_reduction <maximumf>, %18, %cst_9 [1] : vector<128x512xf32> to vector<128xf32>
    %20 = vector.shape_cast %19 : vector<128xf32> to vector<128x1xf32>
    %cst_10 = arith.constant 0.000000e+00 : f32
    %21 = vector.broadcast %cst_10 : f32 to vector<1x512xf32>
    %22 = arith.subf %21, %14 : vector<1x512xf32>
    %cst_11 = arith.constant -1.000000e+30 : f32
    %23 = vector.shape_cast %22 : vector<1x512xf32> to vector<1x512xf32>
    %24 = vector.broadcast %23 : vector<1x512xf32> to vector<128x512xf32>
    %25 = vector.broadcast %cst_11 : f32 to vector<128x512xf32>
    %26 = arith.select %13, %24, %25 : vector<128x512xi1>, vector<128x512xf32>
    %cst_12 = arith.constant dense<0xFF800000> : vector<128xf32>
    %27 = vector.multi_reduction <maximumf>, %26, %cst_12 [1] : vector<128x512xf32> to vector<128xf32>
    %28 = vector.shape_cast %27 : vector<128xf32> to vector<128x1xf32>
    %c0_13 = arith.constant 0 : index
    %c0_14 = arith.constant 0 : index
    %29 = vector.load %arg12[%c0_13, %c0_14] : memref<128x2xf32, #tpu.memory_space<vmem>>, vector<128x2xf32>
    %30 = tpu.concatenate %20, %28 in 1 : vector<128x1xf32>, vector<128x1xf32> -> vector<128x2xf32>
    %31 = arith.maximumf %29, %30 : vector<128x2xf32>
    %c0_15 = arith.constant 0 : index
    %c0_16 = arith.constant 0 : index
    %32 = vector.load %arg12[%c0_15, %c0_16] : memref<128x2xf32, #tpu.memory_space<vmem>>, vector<128x2xf32>
    tpu.vector_store %arg12[%c0_15, %c0_16], %31 {strides = array<i32>} : memref<128x2xf32, #tpu.memory_space<vmem>>, vector<128x2xf32>,
    %c0_i32_17 = arith.constant 0 : i32
    %33 = arith.cmpi eq, %arg1, %c0_i32_17 : i32
    %34 = arith.extui %33 : i1 to i32
    %c0_i32_18 = arith.constant 0 : i32
    %35 = arith.cmpi ne, %34, %c0_i32_18 : i32
    scf.if %35 {
      %c0_19 = arith.constant 0 : index
      %c0_20 = arith.constant 0 : index
      %36 = vector.load %arg12[%c0_19, %c0_20] : memref<128x2xf32, #tpu.memory_space<vmem>>, vector<128x1xf32>
      %c0_21 = arith.constant 0 : index
      %c1_22 = arith.constant 1 : index
      %37 = vector.load %arg12[%c0_21, %c1_22] : memref<128x2xf32, #tpu.memory_space<vmem>>, vector<128x1xf32>
      %cst_23 = arith.constant 0.000000e+00 : f32
      %38 = vector.broadcast %cst_23 : f32 to vector<128x1xf32>
      %39 = arith.subf %38, %37 : vector<128x1xf32>
      %cst_24 = arith.constant -5.000000e+29 : f32
      %40 = vector.broadcast %cst_24 : f32 to vector<128x1xf32>
      %41 = arith.cmpf ogt, %36, %40 : vector<128x1xf32>
      %c0_25 = arith.constant 0 : index
      %c0_26 = arith.constant 0 : index
      %42 = vector.load %arg5[%c0_25, %c0_26] : memref<1x64xf32, #tpu.memory_space<vmem>>, vector<1x64xf32>
      %c0_27 = arith.constant 0 : index
      %c0_28 = arith.constant 0 : index
      %43 = vector.load %arg6[%c0_27, %c0_28] : memref<1x64xf32, #tpu.memory_space<vmem>>, vector<1x64xf32>
      %44 = vector.broadcast %36 : vector<128x1xf32> to vector<128x64xf32>
      %45 = vector.broadcast %42 : vector<1x64xf32> to vector<128x64xf32>
      %46 = arith.mulf %44, %45 : vector<128x64xf32>
      %47 = vector.broadcast %39 : vector<128x1xf32> to vector<128x64xf32>
      %48 = vector.broadcast %42 : vector<1x64xf32> to vector<128x64xf32>
      %49 = arith.mulf %47, %48 : vector<128x64xf32>
      %50 = arith.maximumf %46, %49 : vector<128x64xf32>
      %51 = vector.broadcast %43 : vector<1x64xf32> to vector<128x64xf32>
      %52 = arith.addf %50, %51 : vector<128x64xf32>
      %cst_29 = arith.constant 0.000000e+00 : f32
      %53 = vector.broadcast %cst_29 : f32 to vector<128x64xf32>
      %54 = arith.maximumf %52, %53 : vector<128x64xf32>
      %cst_30 = arith.constant 0.000000e+00 : f32
      %55 = vector.shape_cast %41 : vector<128x1xi1> to vector<128x1xi1>
      %56 = vector.broadcast %55 : vector<128x1xi1> to vector<128x64xi1>
      %57 = vector.broadcast %cst_30 : f32 to vector<128x64xf32>
      %58 = arith.select %56, %54, %57 : vector<128x64xi1>, vector<128x64xf32>
      %59 = arith.truncf %58 : vector<128x64xf32> to vector<128x64xbf16>
      %c0_31 = arith.constant 0 : index
      %c0_32 = arith.constant 0 : index
      %60 = vector.load %arg7[%c0_31, %c0_32] : memref<64x96xbf16, #tpu.memory_space<vmem>>, vector<64x96xbf16>
      %cst_33 = arith.constant dense<0.000000e+00> : vector<128x96xf32>
      %61 = tpu.matmul %59, %60, %cst_33 {dimension_numbers = #tpu.dot_dimension_numbers<[1], [0], [0], [1], [0, 0, 1, 1], [], []>} : vector<128x64xbf16>, vector<64x96xbf16>, vector<128x96xf32> -> vector<128x96xf32>
      %62 = vector.extract_strided_slice %61 {offsets = [0, 0], sizes = [128, 64], strides = [1, 1]} : vector<128x96xf32> to vector<128x64xf32>
      %63 = vector.extract_strided_slice %61 {offsets = [0, 64], sizes = [128, 32], strides = [1, 1]} : vector<128x96xf32> to vector<128x32xf32>
      %c0_34 = arith.constant 0 : index
      %c0_35 = arith.constant 0 : index
      %64 = vector.load %arg8[%c0_34, %c0_35] : memref<128x32xf32, #tpu.memory_space<vmem>>, vector<128x32xf32>
      %65 = arith.addf %63, %64 : vector<128x32xf32>
      %cst_36 = arith.constant 0.000000e+00 : f32
      %66 = vector.broadcast %cst_36 : f32 to vector<128x32xf32>
      %67 = arith.maximumf %65, %66 : vector<128x32xf32>
      %c0_37 = arith.constant 0 : index
      %c0_38 = arith.constant 0 : index
      %68 = vector.load %arg9[%c0_37, %c0_38] : memref<1x32xf32, #tpu.memory_space<vmem>>, vector<1x32xf32>
      %69 = vector.broadcast %68 : vector<1x32xf32> to vector<128x32xf32>
      %70 = arith.mulf %67, %69 : vector<128x32xf32>
      %cst_39 = arith.constant dense<0.000000e+00> : vector<128xf32>
      %71 = vector.multi_reduction <add>, %70, %cst_39 [1] : vector<128x32xf32> to vector<128xf32>
      %72 = vector.shape_cast %71 : vector<128xf32> to vector<128x1xf32>
      %c0_40 = arith.constant 0 : index
      %c0_41 = arith.constant 0 : index
      %73 = vector.load %arg10[%c0_40, %c0_41] : memref<1x1xf32, #tpu.memory_space<vmem>>, vector<1x1xf32>
      %74 = vector.broadcast %73 : vector<1x1xf32> to vector<128x1xf32>
      %75 = arith.addf %72, %74 : vector<128x1xf32>
      %cst_42 = arith.constant 0.000000e+00 : f32
      %76 = vector.broadcast %cst_42 : f32 to vector<128x1xf32>
      %77 = arith.subf %76, %75 : vector<128x1xf32>
      %78 = math.exp %77 : vector<128x1xf32>
      %cst_43 = arith.constant 1.000000e+00 : f32
      %79 = vector.broadcast %cst_43 : f32 to vector<128x1xf32>
      %80 = arith.addf %79, %78 : vector<128x1xf32>
      %cst_44 = arith.constant 1.000000e+00 : f32
      %81 = vector.broadcast %cst_44 : f32 to vector<128x1xf32>
      %82 = arith.divf %81, %80 : vector<128x1xf32>
      %cst_45 = arith.constant 0.000000e+00 : f32
      %83 = vector.broadcast %cst_45 : f32 to vector<128x63xf32>
      %84 = tpu.concatenate %62, %82, %83 in 1 : vector<128x64xf32>, vector<128x1xf32>, vector<128x63xf32> -> vector<128x128xf32>
      %c0_46 = arith.constant 0 : index
      %c0_47 = arith.constant 0 : index
      %85 = vector.load %arg11[%c0_46, %c0_47] : memref<128x128xf32, #tpu.memory_space<vmem>>, vector<128x128xf32>
      tpu.vector_store %arg11[%c0_46, %c0_47], %84 {strides = array<i32>} : memref<128x128xf32, #tpu.memory_space<vmem>>, vector<128x128xf32>,
    } else {
    }
    return
  }
  func.func @transform_0(%arg0: i32, %arg1: i32) -> (i32, i32) {
    %c0_i32 = arith.constant 0 : i32
    %c0_i32_0 = arith.constant 0 : i32
    return %arg0, %c0_i32 : i32, i32
  }
  func.func @transform_1(%arg0: i32, %arg1: i32) -> (i32, i32) {
    %c0_i32 = arith.constant 0 : i32
    %c0_i32_0 = arith.constant 0 : i32
    return %c0_i32, %arg1 : i32, i32
  }
  func.func @transform_2(%arg0: i32, %arg1: i32) -> (i32, i32) {
    %c0_i32 = arith.constant 0 : i32
    %c0_i32_0 = arith.constant 0 : i32
    return %c0_i32, %arg1 : i32, i32
  }
  func.func @transform_3(%arg0: i32, %arg1: i32) -> (i32, i32) {
    %c0_i32 = arith.constant 0 : i32
    %c0_i32_0 = arith.constant 0 : i32
    %c0_i32_1 = arith.constant 0 : i32
    return %c0_i32, %c0_i32_0 : i32, i32
  }
  func.func @transform_4(%arg0: i32, %arg1: i32) -> (i32, i32) {
    %c0_i32 = arith.constant 0 : i32
    %c0_i32_0 = arith.constant 0 : i32
    %c0_i32_1 = arith.constant 0 : i32
    return %c0_i32, %c0_i32_0 : i32, i32
  }
  func.func @transform_5(%arg0: i32, %arg1: i32) -> (i32, i32) {
    %c0_i32 = arith.constant 0 : i32
    %c0_i32_0 = arith.constant 0 : i32
    %c0_i32_1 = arith.constant 0 : i32
    return %c0_i32, %c0_i32_0 : i32, i32
  }
  func.func @transform_6(%arg0: i32, %arg1: i32) -> (i32, i32) {
    %c0_i32 = arith.constant 0 : i32
    %c0_i32_0 = arith.constant 0 : i32
    return %arg0, %c0_i32 : i32, i32
  }
  func.func @transform_7(%arg0: i32, %arg1: i32) -> (i32, i32) {
    %c0_i32 = arith.constant 0 : i32
    %c0_i32_0 = arith.constant 0 : i32
    %c0_i32_1 = arith.constant 0 : i32
    return %c0_i32, %c0_i32_0 : i32, i32
  }
  func.func @transform_8(%arg0: i32, %arg1: i32) -> (i32, i32) {
    %c0_i32 = arith.constant 0 : i32
    %c0_i32_0 = arith.constant 0 : i32
    %c0_i32_1 = arith.constant 0 : i32
    return %c0_i32, %c0_i32_0 : i32, i32
  }
  func.func @transform_9(%arg0: i32, %arg1: i32) -> (i32, i32) {
    %c0_i32 = arith.constant 0 : i32
    %c0_i32_0 = arith.constant 0 : i32
    return %arg0, %c0_i32 : i32, i32
  }
}

</mosaic_0001>

<bundles_post_ra>
// kernel: tpu_custom_call.1
= control target key start
LH: loop header
LB: loop body
LE: loop exit
PB: predicated region body
PF: predicated region fallthrough
CT: control target
= control target key end

     0   :  { %s4625_s0 = inlined_call_operand.vmem [shape: s32[256,2], index: 0, kind: input, shape index: {}]   ;;  %s4626_s1 = inlined_call_operand.vmem [shape: s32[2,512], index: 1, kind: input, shape index: {}]   ;;  %s4627_s2 = inlined_call_operand.vmem [shape: f32[1,512], index: 2, kind: input, shape index: {}]   ;;  %s4628_s3 = inlined_call_operand.vmem [shape: f32[1,64], index: 3, kind: input, shape index: {}]   ;;  %s4629_s4 = inlined_call_operand.vmem [shape: f32[1,64], index: 4, kind: input, shape index: {}]   ;;  %s4630_s5 = inlined_call_operand.vmem [shape: bf16[64,96], index: 5, kind: input, shape index: {}]   ;;  %s4631_s6 = inlined_call_operand.vmem [shape: f32[256,32], index: 6, kind: input, shape index: {}]   ;;  %s4632_s7 = inlined_call_operand.vmem [shape: f32[1,32], index: 7, kind: input, shape index: {}]   ;;  %s4633_s8 = inlined_call_operand.<no memory space> [shape: f32[1,1], index: 8, kind: input, shape index: {}]   ;;  %s4634_s9 = inlined_call_operand.hbm [shape: f32[256,128], index: 9, kind: output, shape index: {}]  }
   0x1   :  { %v14_v0 = vstv %s4633_s8 }
   0x2   :  { %15 = vst [vmem:[#allocation3] sm:$0x1] %v14_v0 }
   0x3   :  { %16 = vsyncpa [#allocation5], 0 }
   0x4   :  { %18 = vsyncpa [#allocation5 + $0x1], 0  ;;  %s2707_s11 = smov 0   ;;  %s2709_s12 = smov 0  }
   0x5   :  { %s2711_s13 = smov 0   ;;  %s2713_s14 = smov 0  }
   0x6   :  { %s2715_s15 = smov 0   ;;  %s2717_s16 = smov 0  }
   0x7 LB: > { %s2338_s8 = sadd.s32 4294967295, %s2645_s16   ;;  %s2339_s17 = sadd.s32 4294967294, %s2645_s16   ;;  %s2645_s16 = sphi %s2717_s16, %s24_s16   ;;  %s2641_s15 = sphi %s2715_s15, %s4831_s15   ;;  %s2637_s14 = sphi %s2713_s14, %s4830_s14   ;;  %s2633_s13 = sphi %s2711_s13, %s4829_s13   ;;  %s2629_s12 = sphi %s2709_s12, %s4828_s12   ;;  %s2625_s11 = sphi %s2707_s11, %s4827_s11  }
   0x8   : > { %s36_s18 = sadd.s32 1, %s2641_s15  ;;  %s252_s19 = sadd.s32 1, %s2633_s13 }
   0x9   : > { %p38_p0 = scmp.ge.s32.totalorder %s36_s18, 2  ;;  %p262_p1 = scmp.ne.s32.totalorder %s2633_s13, %s2629_s12 }
   0xa   : > { %p263_p2 = scmp.eq.s32.totalorder %s2338_s8, 1  ;;  %p268_p3 = scmp.ne.s32.totalorder %s2629_s12, %s2625_s11 }
   0xb   : > { %s4833_s18 = smov (%p38_p0, %s36_s18), 0  ;;  %p269_p5 = scmp.eq.s32.totalorder %s2339_s17, 1 }
   0xc   : > { %p2747_p4 = por %p263_p2, %p262_p1  ;;  %s249_s21 = ssub.s32 %s2641_s15, %s4833_s18 }
   0xd   : > { %p2344_p6 = scmp.ge.s32.totalorder %s2645_s16, 1  ;;  %p250_p7 = scmp.eq.s32.totalorder %s249_s21, 0 }
   0xe   : > { %p2754_p8 = por %p269_p5, %p268_p3  ;;  %p337_p9 = scmp.lt.s32.totalorder %s2645_s16, 3 }
   0xf   : > { %s2760_s23 = scalar_select %p250_p7, %s2633_s13, %s252_s19  }
  0x10   : > { %p338_p10 = pnand %p2344_p6, %p337_p9 }
  0x11   : > { %s2346_s24 = sshll.u32 (!%p338_p10), %s2637_s14, 4  ;;  %s384_s10 = sand.u32 (!%p338_p10), 1, %s2629_s12  }
  0x12   : > { %341 = sbr.rel (%p338_p10) target bundleno = 1279 (0x4ff), region = 56  ;;  %p388_p11 = scmp.lt.s32.totalorder (!%p338_p10), %s2346_s24, 31 }
  0x13   : > { %s2345_s8 = sshll.u32 (!%p338_p10), %s384_s10, 7  ;;  %s2372_s19 = sshll.u32 (!%p338_p10), %s2637_s14, 11 }
  0x14   : > { %s4506_s17 = scalar_lea.vmem (!%p338_p10), [#allocation4], %s2345_s8  ;;  %s4570_s26 = scalar_lea.hbm (!%p338_p10), %s4634_s9, %s2372_s19 }
  0x15   : > { %s4580_s14 = scalar_lea.sflag (!%p338_p10), [#allocation5], %s384_s10 }
  0x17   : > { %v2647_v1 = vmov 1   ;;  %v2648_v2 = vmov 0   ;;  %s4835_s24 = smov (!%p388_p11, %s2346_s24), 31  ;;  %v498_v19 = vlaneseq  ;;  %v449_v25 = vld [vmem:[%s4626_s1] ss:$2 sm:$0xf] }
  0x18   : > { %2479 = vset.pattern.permute.xlu0 %v2647_v1  ;;  %2478 = vset.pattern.permute.xlu1 %v2648_v2  ;;  %s2347_s25 = sshll.u32 %s4835_s24, 3  ;;  %v2350_v29 = vld [vmem:[%s4626_s1 + $0x1] ss:$2 sm:$0xf]  ;;  %s2650_s24 = smov 64  }
  0x19   : > { %s2773_s28 = scalar_lea.vmem %s4625_s0, %s2347_s25  ;;  %v499_v22 = vshrl.u32 %v498_v19, 7  ;;  %v772_v32 = vld [vmem:[%s4627_s2] sm:$0xf]  ;;  %s4220_s21 = scalar_lea.vmem %s4631_s6, %s2347_s25 }
  0x1a   : > { %v441_v3 = vld [vmem:[%s2773_s28 + $0x40] sm:$0xff]  ;;  %v442_v5 = vld [vmem:[%s2773_s28 + $0x48] sm:$0xff]  ;;  %v435_v6 = vld [vmem:[%s2773_s28 + $0x10] sm:$0xff]  ;;  %v938_v38 = vsub.f32 0.0, %v772_v32 }
  0x1b   : > { %v433_v4 = vld [vmem:[%s2773_s28] sm:$0xff]  ;;  %475 = vperm.xlu1 %2478, %v441_v3   ;;  %v434_v7 = vld [vmem:[%s2773_s28 + $0x8] sm:$0xff]  ;;  %v444_v8 = vld [vmem:[%s2773_s28 + $0x58] sm:$0xff]  ;;  %v500_v26 = vsub.s32 0, %v499_v22  ;;  %v504_v28 = vsub.s32 1, %v499_v22  ;;  %v508_v34 = vsub.s32 2, %v499_v22 }
  0x1c   : > { %581 = vperm.xlu0 %2479, %v433_v4   ;;  %v437_v9 = vld [vmem:[%s2773_s28 + $0x20] sm:$0xff]  ;;  %v446_v10 = vld [vmem:[%s2773_s28 + $0x68] sm:$0xff]  ;;  %v443_v11 = vld [vmem:[%s2773_s28 + $0x50] sm:$0xff]  ;;  %v512_v41 = vsub.s32 3, %v499_v22 }
  0x1d   : > { %v439_v12 = vld [vmem:[%s2773_s28 + $0x30] sm:$0xff]  ;;  %v448_v13 = vld [vmem:[%s2773_s28 + $0x78] sm:$0xff]  ;;  %v445_v15 = vld [vmem:[%s2773_s28 + $0x60] sm:$0xff]  ;;  %v2816_v31 = vrot.slane %v449_v25, %v500_v26  ;;  %v2821_v33 = vrot.slane %v449_v25, %v504_v28  ;;  %v2823_v35 = vrot.slane %v2350_v29, %v500_v26  ;;  %v2827_v37 = vrot.slane %v2350_v29, %v504_v28 }
  0x1e   : > { %v436_v14 = vld [vmem:[%s2773_s28 + $0x18] sm:$0xff]  ;;  %v438_v16 = vld [vmem:[%s2773_s28 + $0x28] sm:$0xff]  ;;  %v447_v18 = vld [vmem:[%s2773_s28 + $0x70] sm:$0xff]  ;;  %v2831_v40 = vrot.slane %v449_v25, %v508_v34  ;;  %v2839_v42 = vrot.slane %v449_v25, %v512_v41  ;;  %v2841_v43 = vrot.slane %v2350_v29, %v508_v34  ;;  %v2847_v45 = vrot.slane %v772_v32, %v500_v26 }
  0x1f   : > { %478 = vperm.xlu1 %2478, %v442_v5   ;;  %v440_v17 = vld [vmem:[%s2773_s28 + $0x38] sm:$0xff]  ;;  %v2849_v46 = vrot.slane %v772_v32, %v504_v28  ;;  %v2855_v48 = vrot.slane %v938_v38, %v500_v26  ;;  %v2866_v50 = vrot.slane %v938_v38, %v504_v28  ;;  %v2872_v52 = vrot.slane %v2350_v29, %v512_v41  ;;  %s2651_s28 = smov [#allocation4]  }
  0x20   : > { %608 = vperm.xlu0 %2479, %v442_v5   ;;  %v2883_v54 = vrot.slane %v772_v32, %v508_v34  ;;  %v2915_v60 = vrot.slane %v772_v32, %v512_v41  ;;  %s2573_s29 = sshll.u32 %s2651_s28, 4  ;;  %s2574_s29 = int_to_ptr.vmem [resolvable:$false] %s2573_s29 }
  0x21   : > { %s2575_s30 = scalar_lea.vmem %s2574_s29, 4096 }
  0x23   : > { %2480 = vset.pattern.permute.xlu1 %v2647_v1 }
  0x24   : > { %587 = vperm.xlu0 %2479, %v435_v6   ;;  %584 = vperm.xlu1 %2480, %v434_v7  }
  0x28   : > { %614 = vperm.xlu0 %2479, %v444_v8   ;;  %605 = vperm.xlu1 %2480, %v441_v3   ;;  %v2931_v3 = vrot.slane %v938_v38, %v508_v34 }
  0x2c   : > { %593 = vperm.xlu0 %2479, %v437_v9   ;;  %2481 = vset.pattern.permute.xlu1 %v2648_v2 }
  0x2d   : > { %457 = vperm.xlu1 %2481, %v435_v6  }
  0x30   : > { %620 = vperm.xlu0 %2479, %v446_v10  }
  0x31   : > { %481 = vperm.xlu1 %2481, %v443_v11  }
  0x34   : > { %599 = vperm.xlu0 %2479, %v439_v12  }
  0x35   : > { %484 = vperm.xlu1 %2481, %v444_v8  }
  0x38   : > { %626 = vperm.xlu0 %2479, %v448_v13  }
  0x39   : > { %2482 = vset.pattern.permute.xlu1 %v2647_v1 }
  0x3a   : > { %590 = vperm.xlu1 %2482, %v436_v14  }
  0x3c   : > { %2487 = vset.pattern.permute.xlu0 %v2648_v2 }
  0x3d   : > { %451 = vperm.xlu0 %2487, %v433_v4  }
  0x3e   : > { %611 = vperm.xlu1 %2482, %v443_v11  }
  0x41   : > { %454 = vperm.xlu0 %2487, %v434_v7  }
  0x42   : > { %2483 = vset.pattern.permute.xlu1 %v2648_v2 }
  0x43   : > { %463 = vperm.xlu1 %2483, %v437_v9   ;;  %v2957_v9 = vrot.slane %v938_v38, %v512_v41 }
  0x45   : > { %460 = vperm.xlu0 %2487, %v436_v14  }
  0x47   : > { %487 = vperm.xlu1 %2483, %v445_v15  }
  0x49   : > { %466 = vperm.xlu0 %2487, %v438_v16  }
  0x4b   : > { %490 = vperm.xlu1 %2483, %v446_v10  }
  0x4d   : > { %472 = vperm.xlu0 %2487, %v440_v17  }
  0x4f   : > { %2484 = vset.pattern.permute.xlu1 %v2647_v1 }
  0x50   : > { %596 = vperm.xlu1 %2484, %v438_v16  }
  0x54   : > { %617 = vperm.xlu1 %2484, %v445_v15  }
  0x58   : > { %2485 = vset.pattern.permute.xlu1 %v2648_v2 }
  0x59   : > { %469 = vperm.xlu1 %2485, %v439_v12  }
  0x5d   : > { %493 = vperm.xlu1 %2485, %v447_v18  }
  0x61   : > { %496 = vperm.xlu1 %2485, %v448_v13  }
  0x65   : > { %2486 = vset.pattern.permute.xlu1 %v2647_v1 }
  0x66   : > { %602 = vperm.xlu1 %2486, %v440_v17  }
  0x6a   : > { %623 = vperm.xlu1 %2486, %v447_v18  }
  0x6e   : > { %2488 = vset.pattern.permute.xlu1 %v2648_v2 }
  0x96   : > { %v2800_v20 = vpop.permute.xlu1 %475 }
  0x97   : > { %v2802_v21 = vpop.permute.xlu0 %581  ;;  %vm546_vm10 = vcmp.eq.s32.totalorder %v2800_v20, %v2816_v31  ;;  %vm547_vm11 = vcmp.eq.s32.totalorder %v2800_v20, %v2821_v33 }
  0x9a   : > { %v2804_v23 = vpop.permute.xlu1 %478 }
  0x9b   : > { %v609_v24 = vpop.permute.xlu0 %608  ;;  %vm550_vm0 = vcmp.eq.s32.totalorder %v2804_v23, %v2816_v31  ;;  %vm551_vm2 = vcmp.eq.s32.totalorder %v2804_v23, %v2821_v33  ;;  %vm552_vm7 = vcmp.eq.s32.totalorder %v2804_v23, %v2831_v40  ;;  %vm553_vm13 = vcmp.eq.s32.totalorder %v2804_v23, %v2839_v42 }
  0x9c   : > { %vm680_vm1 = vcmp.eq.s32.totalorder %v609_v24, %v2823_v35  ;;  %vm681_vm3 = vcmp.eq.s32.totalorder %v609_v24, %v2827_v37  ;;  %vm682_vm8 = vcmp.eq.s32.totalorder %v609_v24, %v2841_v43 }
  0x9d   : > { %vm2851_vm5 = vmand %vm550_vm0, %vm680_vm1  ;;  %vm683_vm1 = vcmp.eq.s32.totalorder %v609_v24, %v2872_v52 }
  0x9e   : > { %vm2862_vm9 = vmand %vm551_vm2, %vm681_vm3  ;;  %v830_v58 = vsel %vm2851_vm5, %v2847_v45, -1e+30  ;;  %v996_v61 = vsel %vm2851_vm5, %v2855_v48, -1e+30 }
  0x9f   : > { %v2809_v27 = vpop.permute.xlu0 %587  ;;  %v2814_v30 = vpop.permute.xlu1 %584  ;;  %vm2903_vm2 = vmand %vm552_vm7, %vm682_vm8  ;;  %v831_v59 = vsel %vm2862_vm9, %v2849_v46, -1e+30  ;;  %v997_v62 = vsel %vm2862_vm9, %v2866_v50, -1e+30  ;;  %vm548_vm9 = vcmp.eq.s32.totalorder %v2800_v20, %v2831_v40 }
  0xa0   : > { %vm652_vm3 = vcmp.eq.s32.totalorder %v2809_v27, %v2823_v35  ;;  %vm2953_vm8 = vmand %vm553_vm13, %vm683_vm1  ;;  %v903_v8 = vmax.f32 %v830_v58, %v831_v59  ;;  %v1069_v13 = vmax.f32 %v996_v61, %v997_v62  ;;  %vm644_vm13 = vcmp.eq.s32.totalorder %v2802_v21, %v2823_v35 }
  0xa1   : > { %v832_v19 = vsel %vm2903_vm2, %v2883_v54, -1e+30  ;;  %v833_v22 = vsel %vm2953_vm8, %v2915_v60, -1e+30  ;;  %v998_v25 = vsel %vm2903_vm2, %v2931_v3, -1e+30  ;;  %vm646_vm1 = vcmp.eq.s32.totalorder %v2802_v21, %v2841_v43 }
  0xa2   : > { %v904_v24 = vmax.f32 %v903_v8, %v832_v19  ;;  %v999_v26 = vsel %vm2953_vm8, %v2957_v9, -1e+30  ;;  %vm655_vm2 = vcmp.eq.s32.totalorder %v2809_v27, %v2872_v52  ;;  %v1070_v47 = vmax.f32 %v1069_v13, %v998_v25 }
  0xa3   : > { %v2825_v36 = vpop.permute.xlu0 %614  ;;  %v2829_v39 = vpop.permute.xlu1 %605 }
  0xa4   : > { %vm676_vm4 = vcmp.eq.s32.totalorder %v2829_v39, %v2823_v35  ;;  %vm677_vm6 = vcmp.eq.s32.totalorder %v2829_v39, %v2827_v37  ;;  %vm678_vm7 = vcmp.eq.s32.totalorder %v2829_v39, %v2841_v43 }
  0xa5   : > { %vm2879_vm12 = vmand %vm546_vm10, %vm676_vm4  ;;  %vm653_vm4 = vcmp.eq.s32.totalorder %v2809_v27, %v2827_v37  ;;  %vm549_vm10 = vcmp.eq.s32.totalorder %v2800_v20, %v2839_v42 }
  0xa6   : > { %vm2887_vm14 = vmand %vm547_vm11, %vm677_vm6  ;;  %v826_v4 = vsel %vm2879_vm12, %v2847_v45, -1e+30  ;;  %v992_v10 = vsel %vm2879_vm12, %v2855_v48, -1e+30 }
  0xa7   : > { %v2845_v44 = vpop.permute.xlu0 %593  ;;  %v827_v5 = vsel %vm2887_vm14, %v2849_v46, -1e+30  ;;  %v993_v11 = vsel %vm2887_vm14, %v2866_v50, -1e+30  ;;  %vm2971_vm11 = vmand %vm548_vm9, %vm678_vm7  ;;  %vm679_vm14 = vcmp.eq.s32.totalorder %v2829_v39, %v2872_v52  ;;  %vm647_vm7 = vcmp.eq.s32.totalorder %v2802_v21, %v2872_v52 }
  0xa8   : > { %v2870_v51 = vpop.permute.xlu1 %457  ;;  %v898_v15 = vmax.f32 %v826_v4, %v827_v5  ;;  %v1064_v23 = vmax.f32 %v992_v10, %v993_v11  ;;  %v828_v29 = vsel %vm2971_vm11, %v2883_v54, -1e+30  ;;  %vm3031_vm8 = vmand %vm549_vm10, %vm679_vm14  ;;  %v994_v49 = vsel %vm2971_vm11, %v2931_v3, -1e+30 }
  0xa9   : > { %vm522_vm15 = vcmp.eq.s32.totalorder %v2870_v51, %v2816_v31  ;;  %vm523_vm0 = vcmp.eq.s32.totalorder %v2870_v51, %v2821_v33  ;;  %vm524_vm12 = vcmp.eq.s32.totalorder %v2870_v51, %v2831_v40  ;;  %vm689_vm14 = vcmp.eq.s32.totalorder %v2825_v36, %v2827_v37 }
  0xaa   : > { %vm2925_vm6 = vmand %vm522_vm15, %vm652_vm3  ;;  %vm645_vm15 = vcmp.eq.s32.totalorder %v2802_v21, %v2827_v37  ;;  %vm525_vm3 = vcmp.eq.s32.totalorder %v2870_v51, %v2839_v42  ;;  %v899_v41 = vmax.f32 %v898_v15, %v828_v29  ;;  %v1065_v39 = vmax.f32 %v1064_v23, %v994_v49 }
  0xab   : > { %v2895_v56 = vpop.permute.xlu0 %620  ;;  %vm2944_vm5 = vmand %vm523_vm0, %vm653_vm4  ;;  %v802_v16 = vsel %vm2925_vm6, %v2847_v45, -1e+30  ;;  %vm654_vm0 = vcmp.eq.s32.totalorder %v2809_v27, %v2841_v43  ;;  %v968_v20 = vsel %vm2925_vm6, %v2855_v48, -1e+30  ;;  %v3073_v27 = vmax.f32 %v904_v24, %v833_v22 }
  0xac   : > { %v2929_v0 = vpop.permute.xlu1 %481  ;;  %v803_v17 = vsel %vm2944_vm5, %v2849_v46, -1e+30  ;;  %vm3019_vm4 = vmand %vm524_vm12, %vm654_vm0  ;;  %v969_v53 = vsel %vm2944_vm5, %v2866_v50, -1e+30  ;;  %vm688_vm5 = vcmp.eq.s32.totalorder %v2825_v36, %v2823_v35  ;;  %v829_v51 = vsel %vm3031_vm8, %v2915_v60, -1e+30 }
  0xad   : > { %v868_v34 = vmax.f32 %v802_v16, %v803_v17  ;;  %vm3060_vm11 = vmand %vm525_vm3, %vm655_vm2  ;;  %v804_v58 = vsel %vm3019_vm4, %v2883_v54, -1e+30  ;;  %vm690_vm2 = vcmp.eq.s32.totalorder %v2825_v36, %v2841_v43  ;;  %v3091_v63 = vmax.f32 %v899_v41, %v829_v51 }
  0xae   : > { %v3093_v4 = vmax.f32 %v1070_v47, %v999_v26  ;;  %v995_v5 = vsel %vm3031_vm8, %v2957_v9, -1e+30  ;;  %v1034_v7 = vmax.f32 %v968_v20, %v969_v53  ;;  %v805_v14 = vsel %vm3060_vm11, %v2915_v60, -1e+30 }
  0xaf   : > { %v2965_v12 = vpop.permute.xlu0 %599  ;;  %v869_v59 = vmax.f32 %v868_v34, %v804_v58  ;;  %v3108_v8 = vmax.f32 %v1065_v39, %v995_v5  ;;  %v970_v19 = vsel %vm3019_vm4, %v2931_v3, -1e+30  ;;  %v971_v22 = vsel %vm3060_vm11, %v2957_v9, -1e+30 }
  0xb0   : > { %v2983_v18 = vpop.permute.xlu1 %484  ;;  %v1035_v29 = vmax.f32 %v1034_v7, %v970_v19 }
  0xb1   : > { %vm558_vm9 = vcmp.eq.s32.totalorder %v2983_v18, %v2816_v31  ;;  %vm559_vm0 = vcmp.eq.s32.totalorder %v2983_v18, %v2821_v33  ;;  %vm560_vm6 = vcmp.eq.s32.totalorder %v2983_v18, %v2831_v40  ;;  %v3144_v17 = vmax.f32 %v869_v59, %v805_v14 }
  0xb2   : > { %vm3085_vm10 = vmand %vm558_vm9, %vm688_vm5 }
  0xb3   : > { %v3005_v28 = vpop.permute.xlu0 %626  ;;  %vm3101_vm3 = vmand %vm559_vm0, %vm689_vm14  ;;  %v838_v26 = vsel %vm3085_vm10, %v2847_v45, -1e+30  ;;  %v1004_v32 = vsel %vm3085_vm10, %v2855_v48, -1e+30 }
  0xb4   : > { %vm3113_vm8 = vmand %vm560_vm6, %vm690_vm2  ;;  %v839_v41 = vsel %vm3101_vm3, %v2849_v46, -1e+30  ;;  %vm4683_vm2 = vcmp.eq.s32.totalorder %v2814_v30, %v2827_v37  ;;  %v1005_v15 = vsel %vm3101_vm3, %v2866_v50, -1e+30 }
  0xb5   : > { %v3050_v55 = vpop.permute.xlu1 %590  ;;  %v913_v59 = vmax.f32 %v838_v26, %v839_v41 }
  0xb8   : > { %v452_v62 = vpop.permute.xlu0 %451 }
  0xb9   : > { %vm514_vm9 = vcmp.eq.s32.totalorder %v452_v62, %v2816_v31  ;;  %vm515_vm5 = vcmp.eq.s32.totalorder %v452_v62, %v2821_v33  ;;  %vm516_vm12 = vcmp.eq.s32.totalorder %v452_v62, %v2831_v40  ;;  %v3117_v11 = vpop.permute.xlu1 %611 }
  0xba   : > { %vm3123_vm14 = vmand %vm514_vm9, %vm644_vm13  ;;  %vm4680_vm9 = vcmp.eq.s32.totalorder %v2814_v30, %v2823_v35 }
  0xbb   : > { %vm3137_vm0 = vmand %vm515_vm5, %vm645_vm15  ;;  %v794_v16 = vsel %vm3123_vm14, %v2847_v45, -1e+30  ;;  %vm691_vm15 = vcmp.eq.s32.totalorder %v2825_v36, %v2872_v52 }
  0xbc   : > { %v455_v23 = vpop.permute.xlu0 %454  ;;  %vm3157_vm13 = vmand %vm516_vm12, %vm646_vm1  ;;  %v795_v25 = vsel %vm3137_vm0, %v2849_v46, -1e+30  ;;  %vm4677_vm1 = vcmp.eq.s32.totalorder %v452_v62, %v2839_v42  ;;  %v961_v19 = vsel %vm3137_vm0, %v2866_v50, -1e+30 }
  0xbd   : > { %vm3177_vm4 = vmand %vm4677_vm1, %vm647_vm7  ;;  %v858_v38 = vmax.f32 %v794_v16, %v795_v25  ;;  %vm518_vm12 = vcmp.eq.s32.totalorder %v455_v23, %v2816_v31  ;;  %vm519_vm11 = vcmp.eq.s32.totalorder %v455_v23, %v2821_v33  ;;  %v796_v47 = vsel %vm3157_vm13, %v2883_v54, -1e+30 }
  0xbe   : > { %vm520_vm10 = vcmp.eq.s32.totalorder %v455_v23, %v2831_v40  ;;  %vm521_vm7 = vcmp.eq.s32.totalorder %v455_v23, %v2839_v42  ;;  %vm3194_vm5 = vmand %vm518_vm12, %vm4680_vm9  ;;  %vm656_vm1 = vcmp.eq.s32.totalorder %v3050_v55, %v2823_v35  ;;  %v3202_v49 = vpop.permute.xlu1 %463  ;;  %vm684_vm12 = vcmp.eq.s32.totalorder %v3117_v11, %v2823_v35 }
  0xbf   : > { %v859_v39 = vmax.f32 %v858_v38, %v796_v47  ;;  %vm3207_vm6 = vmand %vm519_vm11, %vm4683_vm2  ;;  %v798_v53 = vsel %vm3194_vm5, %v2847_v45, -1e+30  ;;  %v964_v57 = vsel %vm3194_vm5, %v2855_v48, -1e+30  ;;  %v797_v51 = vsel %vm3177_vm4, %v2915_v60, -1e+30 }
  0xc0   : > { %v3219_v58 = vpop.permute.xlu0 %460  ;;  %vm4686_vm2 = vcmp.eq.s32.totalorder %v2814_v30, %v2841_v43  ;;  %v799_v61 = vsel %vm3207_vm6, %v2849_v46, -1e+30  ;;  %v965_v62 = vsel %vm3207_vm6, %v2866_v50, -1e+30  ;;  %vm685_vm9 = vcmp.eq.s32.totalorder %v3117_v11, %v2827_v37 }
  0xc1   : > { %vm3227_vm11 = vmand %vm520_vm10, %vm4686_vm2  ;;  %v860_v5 = vmax.f32 %v859_v39, %v797_v51  ;;  %vm4689_vm5 = vcmp.eq.s32.totalorder %v2814_v30, %v2872_v52  ;;  %v863_v14 = vmax.f32 %v798_v53, %v799_v61  ;;  %v960_v16 = vsel %vm3123_vm14, %v2855_v48, -1e+30 }
  0xc2   : > { %vm3244_vm10 = vmand %vm521_vm7, %vm4689_vm5  ;;  %v800_v25 = vsel %vm3227_vm11, %v2883_v54, -1e+30  ;;  %v1029_v30 = vmax.f32 %v964_v57, %v965_v62  ;;  %vm657_vm6 = vcmp.eq.s32.totalorder %v3050_v55, %v2827_v37  ;;  %vm4692_vm7 = vcmp.eq.s32.totalorder %v2929_v0, %v2816_v31  ;;  %v3272_v23 = vpop.permute.xlu1 %487 }
  0xc3   : > { %vm3265_vm2 = vmand %vm4692_vm7, %vm684_vm12  ;;  %861 = vmax.xlane.f32.xlu1 %v860_v5  ;;  %v864_v38 = vmax.f32 %v863_v14, %v800_v25  ;;  %vm526_vm0 = vcmp.eq.s32.totalorder %v3219_v58, %v2816_v31  ;;  %vm527_vm14 = vcmp.eq.s32.totalorder %v3219_v58, %v2821_v33  ;;  %vm4695_vm5 = vcmp.eq.s32.totalorder %v2929_v0, %v2821_v33 }
  0xc4   : > { %vm3286_vm3 = vmand %vm4695_vm5, %vm685_vm9  ;;  %v3290_v47 = vmax.f32 %v1035_v29, %v971_v22  ;;  %v801_v21 = vsel %vm3244_vm10, %v2915_v60, -1e+30  ;;  %v966_v39 = vsel %vm3227_vm11, %v2931_v3, -1e+30  ;;  %v1024_v20 = vmax.f32 %v960_v16, %v961_v19 }
  0xc5   : > { %vm3301_vm7 = vmand %vm526_vm0, %vm656_vm1  ;;  %v840_v22 = vsel %vm3113_vm8, %v2883_v54, -1e+30  ;;  %v865_v29 = vmax.f32 %v864_v38, %v801_v21  ;;  %v1030_v57 = vmax.f32 %v1029_v30, %v966_v39  ;;  %v1079_v61 = vmax.f32 %v1004_v32, %v1005_v15  ;;  %v3379_v30 = vpop.permute.xlu0 %466 }
  0xc6   : > { %vm3311_vm9 = vmand %vm527_vm14, %vm657_vm6  ;;  %vm528_vm1 = vcmp.eq.s32.totalorder %v3219_v58, %v2831_v40  ;;  %vm658_vm11 = vcmp.eq.s32.totalorder %v3050_v55, %v2841_v43  ;;  %v806_v62 = vsel %vm3301_vm7, %v2847_v45, -1e+30  ;;  %v3326_v14 = vpop.permute.xlu1 %490  ;;  %v962_v26 = vsel %vm3157_vm13, %v2931_v3, -1e+30 }
  0xc7   : > { %v807_v5 = vsel %vm3311_vm9, %v2849_v46, -1e+30  ;;  %906 = vmax.xlane.f32.xlu1 %v3073_v27  ;;  %866 = vmax.xlane.f32.xlu0 %v865_v29  ;;  %vm659_vm6 = vcmp.eq.s32.totalorder %v3050_v55, %v2872_v52  ;;  %vm4702_vm0 = vcmp.eq.s32.totalorder %v2983_v18, %v2839_v42  ;;  %vm557_vm5 = vcmp.eq.s32.totalorder %v2929_v0, %v2839_v42 }
  0xc8   : > { %vm3339_vm14 = vmand %vm4702_vm0, %vm691_vm15  ;;  %vm686_vm12 = vcmp.eq.s32.totalorder %v3117_v11, %v2841_v43  ;;  %v1006_v27 = vsel %vm3113_vm8, %v2931_v3, -1e+30  ;;  %v967_v36 = vsel %vm3244_vm10, %v2957_v9, -1e+30  ;;  %v1025_v24 = vmax.f32 %v1024_v20, %v962_v26 }
  0xc9   : > { %v834_v18 = vsel %vm3265_vm2, %v2847_v45, -1e+30  ;;  %v835_v41 = vsel %vm3286_vm3, %v2849_v46, -1e+30  ;;  %vm660_vm13 = vcmp.eq.s32.totalorder %v2845_v44, %v2823_v35  ;;  %v1031_v16 = vmax.f32 %v1030_v57, %v967_v36  ;;  %vm3367_vm8 = vmand %vm528_vm1, %vm658_vm11 }
  0xca   : > { %v873_v7 = vmax.f32 %v806_v62, %v807_v5  ;;  %v972_v19 = vsel %vm3301_vm7, %v2855_v48, -1e+30  ;;  %v973_v25 = vsel %vm3311_vm9, %v2866_v50, -1e+30  ;;  %vm661_vm15 = vcmp.eq.s32.totalorder %v2845_v44, %v2827_v37 }
  0xcb   : > { %vm529_vm10 = vcmp.eq.s32.totalorder %v3219_v58, %v2839_v42  ;;  %v841_v15 = vsel %vm3339_vm14, %v2915_v60, -1e+30  ;;  %v914_v38 = vmax.f32 %v913_v59, %v840_v22  ;;  %v1080_v21 = vmax.f32 %v1079_v61, %v1006_v27  ;;  %1032 = vmax.xlane.f32.xlu1 %v1031_v16  ;;  %901 = vmax.xlane.f32.xlu0 %v3091_v63  ;;  %v3398_v22 = vpop.permute.xlu1 %596 }
  0xcc   : > { %v963_v39 = vsel %vm3177_vm4, %v2957_v9, -1e+30  ;;  %vm687_vm7 = vcmp.eq.s32.totalorder %v3117_v11, %v2872_v52  ;;  %v1000_v20 = vsel %vm3265_vm2, %v2855_v48, -1e+30  ;;  %v1001_v53 = vsel %vm3286_vm3, %v2866_v50, -1e+30  ;;  %vm3421_vm3 = vmand %vm529_vm10, %vm659_vm6 }
  0xcd   : > { %v1026_v29 = vmax.f32 %v1025_v24, %v963_v39  ;;  %v808_v63 = vsel %vm3367_vm8, %v2883_v54, -1e+30  ;;  %vm4707_vm4 = vcmp.eq.s32.totalorder %v2929_v0, %v2831_v40  ;;  %v908_v13 = vmax.f32 %v834_v18, %v835_v41 }
  0xce   : > { %vm3409_vm9 = vmand %vm4707_vm4, %vm686_vm12  ;;  %v1039_v6 = vmax.f32 %v972_v19, %v973_v25  ;;  %vm696_vm2 = vcmp.eq.s32.totalorder %v2895_v56, %v2823_v35  ;;  %v874_v51 = vmax.f32 %v873_v7, %v808_v63  ;;  %vm534_vm12 = vcmp.eq.s32.totalorder %v3379_v30, %v2816_v31 }
  0xcf   : > { %vm664_vm1 = vcmp.eq.s32.totalorder %v3398_v22, %v2823_v35  ;;  %vm665_vm11 = vcmp.eq.s32.totalorder %v3398_v22, %v2827_v37  ;;  %vm697_vm0 = vcmp.eq.s32.totalorder %v2895_v56, %v2827_v37  ;;  %v1007_v55 = vsel %vm3339_vm14, %v2957_v9, -1e+30  ;;  %1072 = vmax.xlane.f32.xlu1 %v3093_v4  ;;  %1027 = vmax.xlane.f32.xlu0 %v1026_v29  ;;  %v3459_v4 = vpop.permute.xlu1 %617 }
  0xd0   : > { %v1074_v58 = vmax.f32 %v1000_v20, %v1001_v53  ;;  %vm535_vm6 = vcmp.eq.s32.totalorder %v3379_v30, %v2821_v33  ;;  %vm3438_vm10 = vmand %vm534_vm12, %vm664_vm1  ;;  %vm530_vm4 = vcmp.eq.s32.totalorder %v3202_v49, %v2816_v31  ;;  %v915_v61 = vmax.f32 %v914_v38, %v841_v15 }
  0xd1   : > { %v836_v62 = vsel %vm3409_vm9, %v2883_v54, -1e+30  ;;  %v974_v5 = vsel %vm3367_vm8, %v2931_v3, -1e+30  ;;  %vm3451_vm14 = vmand %vm535_vm6, %vm665_vm11  ;;  %vm531_vm12 = vcmp.eq.s32.totalorder %v3202_v49, %v2821_v33  ;;  %vm662_vm1 = vcmp.eq.s32.totalorder %v2845_v44, %v2841_v43 }
  0xd2   : > { %v809_v32 = vsel %vm3421_vm3, %v2915_v60, -1e+30  ;;  %vm3470_vm8 = vmand %vm557_vm5, %vm687_vm7  ;;  %v909_v36 = vmax.f32 %v908_v13, %v836_v62  ;;  %v1040_v24 = vmax.f32 %v1039_v6, %v974_v5  ;;  %v3474_v18 = vmax.f32 %v1080_v21, %v1007_v55 }
  0xd3   : > { %v875_v41 = vmax.f32 %v874_v51, %v809_v32  ;;  %v975_v16 = vsel %vm3421_vm3, %v2957_v9, -1e+30  ;;  %v1002_v0 = vsel %vm3409_vm9, %v2931_v3, -1e+30  ;;  %vm666_vm5 = vcmp.eq.s32.totalorder %v3398_v22, %v2841_v43  ;;  %vm3492_vm7 = vmand %vm530_vm4, %vm660_vm13  ;;  %1067 = vmax.xlane.f32.xlu0 %v3108_v8 }
  0xd4   : > { %v1075_v10 = vmax.f32 %v1074_v58, %v1002_v0  ;;  %v814_v7 = vsel %vm3438_vm10, %v2847_v45, -1e+30  ;;  %v815_v19 = vsel %vm3451_vm14, %v2849_v46, -1e+30  ;;  %vm3508_vm9 = vmand %vm531_vm12, %vm661_vm15  ;;  %vm566_vm13 = vcmp.eq.s32.totalorder %v3326_v14, %v2816_v31  ;;  %v3541_v53 = vpop.permute.xlu1 %469 }
  0xd5   : > { %876 = vmax.xlane.f32.xlu1 %v875_v41  ;;  %v837_v15 = vsel %vm3470_vm8, %v2915_v60, -1e+30  ;;  %v1003_v38 = vsel %vm3470_vm8, %v2957_v9, -1e+30  ;;  %vm536_vm15 = vcmp.eq.s32.totalorder %v3379_v30, %v2831_v40  ;;  %vm567_vm3 = vcmp.eq.s32.totalorder %v3326_v14, %v2821_v33  ;;  %v3667_v41 = vpop.permute.xlu0 %472 }
  0xd6   : > { %v910_v21 = vmax.f32 %v909_v36, %v837_v15  ;;  %v1041_v8 = vmax.f32 %v1040_v24, %v975_v16  ;;  %vm667_vm4 = vcmp.eq.s32.totalorder %v3398_v22, %v2872_v52  ;;  %vm3532_vm12 = vmand %vm536_vm15, %vm666_vm5  ;;  %v810_v20 = vsel %vm3492_vm7, %v2847_v45, -1e+30 }
  0xd7   : > { %vm537_vm6 = vcmp.eq.s32.totalorder %v3379_v30, %v2839_v42  ;;  %v883_v29 = vmax.f32 %v814_v7, %v815_v19  ;;  %vm532_vm11 = vcmp.eq.s32.totalorder %v3202_v49, %v2831_v40  ;;  %v811_v63 = vsel %vm3508_vm9, %v2849_v46, -1e+30  ;;  %vm3556_vm5 = vmand %vm566_vm13, %vm696_vm2  ;;  %871 = vmax.xlane.f32.xlu0 %v3144_v17 }
  0xd8   : > { %v3560_v13 = vmax.f32 %v1075_v10, %v1003_v38  ;;  %vm533_vm15 = vcmp.eq.s32.totalorder %v3202_v49, %v2839_v42  ;;  %vm3570_vm8 = vmand %vm567_vm3, %vm697_vm0  ;;  %v980_v6 = vsel %vm3438_vm10, %v2855_v48, -1e+30  ;;  %v981_v57 = vsel %vm3451_vm14, %v2866_v50, -1e+30  ;;  %v3611_v58 = vpop.permute.xlu1 %493 }
  0xd9   : > { %916 = vmax.xlane.f32.xlu1 %v915_v61  ;;  %vm3584_vm2 = vmand %vm537_vm6, %vm667_vm4  ;;  %vm692_vm13 = vcmp.eq.s32.totalorder %v3459_v4, %v2823_v35  ;;  %v816_v17 = vsel %vm3532_vm12, %v2883_v54, -1e+30  ;;  %v878_v55 = vmax.f32 %v810_v20, %v811_v63  ;;  %vm562_vm3 = vcmp.eq.s32.totalorder %v3272_v23, %v2816_v31 }
  0xda   : > { %vm3603_vm14 = vmand %vm532_vm11, %vm662_vm1  ;;  %vm693_vm6 = vcmp.eq.s32.totalorder %v3459_v4, %v2827_v37  ;;  %v884_v59 = vmax.f32 %v883_v29, %v816_v17  ;;  %vm4732_vm4 = vcmp.eq.s32.totalorder %v2845_v44, %v2872_v52  ;;  %v846_v62 = vsel %vm3556_vm5, %v2847_v45, -1e+30 }
  0xdb   : > { %vm3619_vm1 = vmand %vm533_vm15, %vm4732_vm4  ;;  %v847_v5 = vsel %vm3570_vm8, %v2849_v46, -1e+30  ;;  %v1049_v26 = vmax.f32 %v980_v6, %v981_v57  ;;  %v817_v44 = vsel %vm3584_vm2, %v2915_v60, -1e+30  ;;  %vm563_vm15 = vcmp.eq.s32.totalorder %v3272_v23, %v2821_v33  ;;  %911 = vmax.xlane.f32.xlu0 %v910_v21 }
  0xdc   : > { %vm3643_vm0 = vmand %vm562_vm3, %vm692_vm13  ;;  %vm669_vm11 = vcmp.eq.s32.totalorder %v2965_v12, %v2827_v37  ;;  %v812_v32 = vsel %vm3603_vm14, %v2883_v54, -1e+30  ;;  %vm694_vm4 = vcmp.eq.s32.totalorder %v3459_v4, %v2841_v43  ;;  %v976_v36 = vsel %vm3492_vm7, %v2855_v48, -1e+30  ;;  %v3684_v7 = vpop.permute.xlu1 %496 }
  0xdd   : > { %1042 = vmax.xlane.f32.xlu1 %v1041_v8  ;;  %vm3657_vm10 = vmand %vm563_vm15, %vm693_vm6  ;;  %v977_v24 = vsel %vm3508_vm9, %v2866_v50, -1e+30  ;;  %v879_v16 = vmax.f32 %v878_v55, %v812_v32  ;;  %vm4739_vm13 = vcmp.eq.s32.totalorder %v2895_v56, %v2841_v43  ;;  %vm4740_vm3 = vcmp.eq.s32.totalorder %v3326_v14, %v2831_v40 }
  0xde   : > { %vm3675_vm6 = vmand %vm4740_vm3, %vm4739_vm13  ;;  %v923_v10 = vmax.f32 %v846_v62, %v847_v5  ;;  %vm695_vm7 = vcmp.eq.s32.totalorder %v3459_v4, %v2872_v52  ;;  %v982_v11 = vsel %vm3532_vm12, %v2931_v3, -1e+30  ;;  %v885_v19 = vmax.f32 %v884_v59, %v817_v44 }
  0xdf   : > { %v813_v25 = vsel %vm3619_vm1, %v2915_v60, -1e+30  ;;  %vm4743_vm9 = vcmp.eq.s32.totalorder %v2895_v56, %v2872_v52  ;;  %vm4744_vm15 = vcmp.eq.s32.totalorder %v3326_v14, %v2839_v42  ;;  %v1050_v38 = vmax.f32 %v1049_v26, %v982_v11  ;;  %1037 = vmax.xlane.f32.xlu0 %v3290_v47 }
  0xe0   : > { %vm3695_vm13 = vmand %vm4744_vm15, %vm4743_vm9  ;;  %v1012_v21 = vsel %vm3556_vm5, %v2855_v48, -1e+30  ;;  %v842_v8 = vsel %vm3643_vm0, %v2847_v45, -1e+30  ;;  %v843_v56 = vsel %vm3657_vm10, %v2849_v46, -1e+30  ;;  %v1044_v39 = vmax.f32 %v976_v36, %v977_v24 }
  0xe1   : > { %v1013_v14 = vsel %vm3570_vm8, %v2866_v50, -1e+30  ;;  %vm670_vm12 = vcmp.eq.s32.totalorder %v2965_v12, %v2841_v43  ;;  %1082 = vmax.xlane.f32.xlu1 %v3474_v18  ;;  %v848_v20 = vsel %vm3675_vm6, %v2883_v54, -1e+30  ;;  %v983_v29 = vsel %vm3584_vm2, %v2957_v9, -1e+30  ;;  %v603_v4 = vpop.permute.xlu1 %602 }
  0xe2   : > { %v978_v63 = vsel %vm3603_vm14, %v2931_v3, -1e+30  ;;  %vm542_vm8 = vcmp.eq.s32.totalorder %v3667_v41, %v2816_v31  ;;  %v880_v34 = vmax.f32 %v879_v16, %v813_v25  ;;  %v849_v47 = vsel %vm3695_vm13, %v2915_v60, -1e+30 }
  0xe3   : > { %v924_v18 = vmax.f32 %v923_v10, %v848_v20  ;;  %vm4747_vm5 = vcmp.eq.s32.totalorder %v3272_v23, %v2831_v40  ;;  %vm538_vm14 = vcmp.eq.s32.totalorder %v3541_v53, %v2816_v31  ;;  %vm704_vm3 = vcmp.eq.s32.totalorder %v3005_v28, %v2823_v35  ;;  %1077 = vmax.xlane.f32.xlu0 %v3560_v13 }
  0xe4   : > { %vm3735_vm2 = vmand %vm4747_vm5, %vm694_vm4  ;;  %vm4750_vm9 = vcmp.eq.s32.totalorder %v3272_v23, %v2839_v42  ;;  %v918_v57 = vmax.f32 %v842_v8, %v843_v56  ;;  %v979_v51 = vsel %vm3619_vm1, %v2957_v9, -1e+30  ;;  %v1089_v17 = vmax.f32 %v1012_v21, %v1013_v14 }
  0xe5   : > { %vm3749_vm15 = vmand %vm4750_vm9, %vm695_vm7  ;;  %vm539_vm4 = vcmp.eq.s32.totalorder %v3541_v53, %v2821_v33  ;;  %vm705_vm5 = vcmp.eq.s32.totalorder %v3005_v28, %v2827_v37  ;;  %v1051_v22 = vmax.f32 %v1050_v38, %v983_v29  ;;  %v1045_v55 = vmax.f32 %v1044_v39, %v978_v63  ;;  %886 = vmax.xlane.f32.xlu1 %v885_v19  ;;  %v3823_v11 = vpop.permute.xlu1 %623 }
  0xe6   : > { %v1014_v23 = vsel %vm3675_vm6, %v2931_v3, -1e+30  ;;  %v1015_v59 = vsel %vm3695_vm13, %v2957_v9, -1e+30  ;;  %vm4753_vm1 = vcmp.eq.s32.totalorder %v2965_v12, %v2823_v35  ;;  %v1008_v62 = vsel %vm3643_vm0, %v2855_v48, -1e+30 }
  0xe7   : > { %vm3769_vm7 = vmand %vm538_vm14, %vm4753_vm1  ;;  %v1009_v5 = vsel %vm3657_vm10, %v2866_v50, -1e+30  ;;  %vm672_vm6 = vcmp.eq.s32.totalorder %v603_v4, %v2823_v35  ;;  %vm673_vm13 = vcmp.eq.s32.totalorder %v603_v4, %v2827_v37  ;;  %v925_v13 = vmax.f32 %v924_v18, %v849_v47  ;;  %881 = vmax.xlane.f32.xlu0 %v880_v34 }
  0xe8   : > { %vm3785_vm14 = vmand %vm539_vm4, %vm669_vm11  ;;  %v844_v44 = vsel %vm3735_vm2, %v2883_v54, -1e+30  ;;  %vm543_vm0 = vcmp.eq.s32.totalorder %v3667_v41, %v2821_v33  ;;  %vm540_vm11 = vcmp.eq.s32.totalorder %v3541_v53, %v2831_v40  ;;  %v845_v32 = vsel %vm3749_vm15, %v2915_v60, -1e+30 }
  0xe9   : > { %vm3799_vm10 = vmand %vm542_vm8, %vm672_vm6  ;;  %v919_v27 = vmax.f32 %v918_v57, %v844_v44  ;;  %v1090_v36 = vmax.f32 %v1089_v17, %v1014_v23  ;;  %vm674_vm4 = vcmp.eq.s32.totalorder %v603_v4, %v2841_v43  ;;  %v1084_v16 = vmax.f32 %v1008_v62, %v1009_v5  ;;  %926 = vmax.xlane.f32.xlu1 %v925_v13 }
  0xea   : > { %vm3809_vm1 = vmand %vm543_vm0, %vm673_vm13  ;;  %v822_v0 = vsel %vm3799_vm10, %v2847_v45, -1e+30  ;;  %vm574_vm6 = vcmp.eq.s32.totalorder %v3684_v7, %v2816_v31  ;;  %v1046_v19 = vmax.f32 %v1045_v55, %v979_v51  ;;  %v1010_v25 = vsel %vm3735_vm2, %v2931_v3, -1e+30 }
  0xeb   : > { %v823_v10 = vsel %vm3809_vm1, %v2849_v46, -1e+30  ;;  %vm544_vm13 = vcmp.eq.s32.totalorder %v3667_v41, %v2831_v40  ;;  %vm3836_vm0 = vmand %vm540_vm11, %vm670_vm12  ;;  %vm575_vm8 = vcmp.eq.s32.totalorder %v3684_v7, %v2821_v33  ;;  %v1011_v38 = vsel %vm3749_vm15, %v2957_v9, -1e+30 }
  0xec   : > { %vm675_vm2 = vcmp.eq.s32.totalorder %v603_v4, %v2872_v52  ;;  %vm3848_vm9 = vmand %vm544_vm13, %vm674_vm4  ;;  %v4764_v21 = vmov 0  ;;  %v818_v8 = vsel %vm3769_vm7, %v2847_v45, -1e+30  ;;  %v819_v56 = vsel %vm3785_vm14, %v2849_v46, -1e+30 }
  0xed   : > { %v4765_v21 = vsel %vm3848_vm9, 4294967295, %v4764_v21  ;;  %v920_v39 = vmax.f32 %v919_v27, %v845_v32  ;;  %v1091_v14 = vmax.f32 %v1090_v36, %v1015_v59  ;;  %v893_v20 = vmax.f32 %v822_v0, %v823_v10  ;;  %vm3866_vm15 = vmand %vm574_vm6, %vm704_vm3  ;;  %1052 = vmax.xlane.f32.xlu1 %v1051_v22 }
  0xee   : > { %vm576_vm12 = vcmp.eq.s32.totalorder %v3684_v7, %v2831_v40  ;;  %v1085_v63 = vmax.f32 %v1084_v16, %v1010_v25  ;;  %vm545_vm11 = vcmp.eq.s32.totalorder %v3667_v41, %v2839_v42  ;;  %vm3875_vm4 = vmand %vm575_vm8, %vm705_vm5  ;;  %v854_v47 = vsel %vm3866_vm15, %v2847_v45, -1e+30 }
  0xef   : > { %921 = vmax.xlane.f32.xlu0 %v920_v39  ;;  %vm3886_vm6 = vmand %vm545_vm11, %vm675_vm2  ;;  %v888_v18 = vmax.f32 %v818_v8, %v819_v56  ;;  %v855_v30 = vsel %vm3875_vm4, %v2849_v46, -1e+30  ;;  %vm701_vm8 = vcmp.eq.s32.totalorder %v3823_v11, %v2827_v37  ;;  %v824_v6 = vsel %vm3848_vm9, %v2883_v54, -1e+30 }
  0xf0   : > { %vm4772_vm2 = vcmp.eq.s32.totalorder %v3005_v28, %v2841_v43  ;;  %vm570_vm5 = vcmp.eq.s32.totalorder %v3611_v58, %v2816_v31  ;;  %vm571_vm3 = vcmp.eq.s32.totalorder %v3611_v58, %v2821_v33  ;;  %v894_v37 = vmax.f32 %v893_v20, %v824_v6 }
  0xf1   : > { %vm3908_vm11 = vmand %vm576_vm12, %vm4772_vm2  ;;  %v933_v51 = vmax.f32 %v854_v47, %v855_v30  ;;  %vm4775_vm13 = vcmp.eq.s32.totalorder %v3823_v11, %v2823_v35  ;;  %v988_v4 = vsel %vm3799_vm10, %v2855_v48, -1e+30  ;;  %v989_v31 = vsel %vm3809_vm1, %v2866_v50, -1e+30  ;;  %1092 = vmax.xlane.f32.xlu1 %v1091_v14 }
  0xf2   : > { %vm3919_vm9 = vmand %vm570_vm5, %vm4775_vm13  ;;  %v820_v33 = vsel %vm3836_vm0, %v2883_v54, -1e+30  ;;  %vm702_vm12 = vcmp.eq.s32.totalorder %v3823_v11, %v2841_v43  ;;  %v1086_v55 = vmax.f32 %v1085_v63, %v1011_v38  ;;  %vm4780_vm1 = vcmp.eq.s32.totalorder %v2965_v12, %v2872_v52 }
  0xf3   : > { %vm3934_vm2 = vmand %vm571_vm3, %vm701_vm8  ;;  %v850_v22 = vsel %vm3919_vm9, %v2847_v45, -1e+30  ;;  %1047 = vmax.xlane.f32.xlu0 %v1046_v19  ;;  %vm4781_vm5 = vcmp.eq.s32.totalorder %v3541_v53, %v2839_v42  ;;  %v4782_v23 = vmov 0  ;;  %v889_v59 = vmax.f32 %v888_v18, %v820_v33 }
  0xf4   : > { %vm3947_vm13 = vmand %vm4781_vm5, %vm4780_vm1  ;;  %vm707_vm3 = vcmp.eq.s32.totalorder %v3005_v28, %v2872_v52  ;;  %v851_v45 = vsel %vm3934_vm2, %v2849_v46, -1e+30  ;;  %v825_v62 = vsel %vm3886_vm6, %v2915_v60, -1e+30  ;;  %vm4784_vm8 = vcmp.eq.s32.totalorder %v3684_v7, %v2839_v42 }
  0xf5   : > { %v4783_v23 = vsel %vm3947_vm13, 4294967295, %v4782_v23  ;;  %vm3962_vm10 = vmand %vm4784_vm8, %vm707_vm3  ;;  %v4785_v12 = vmov 0  ;;  %v856_v53 = vsel %vm3908_vm11, %v2883_v54, -1e+30  ;;  %vm572_vm1 = vcmp.eq.s32.totalorder %v3611_v58, %v2831_v40 }
  0xf6   : > { %v4786_v12 = vsel %vm3962_vm10, 4294967295, %v4785_v12  ;;  %v1059_v28 = vmax.f32 %v988_v4, %v989_v31  ;;  %v895_v46 = vmax.f32 %v894_v37, %v825_v62  ;;  %v934_v5 = vmax.f32 %v933_v51, %v856_v53  ;;  %vm3974_vm5 = vmand %vm572_vm1, %vm702_vm12 }
  0xf7   : > { %v4787_v13 = vmov 0  ;;  %v928_v7 = vmax.f32 %v850_v22, %v851_v45  ;;  %v984_v44 = vsel %vm3769_vm7, %v2855_v48, -1e+30  ;;  %v985_v40 = vsel %vm3785_vm14, %v2866_v50, -1e+30  ;;  %1087 = vmax.xlane.f32.xlu0 %v1086_v55 }
  0xf8   : > { %v4788_v13 = vsel %vm3974_vm5, 4294967295, %v4787_v13  ;;  %v1020_v43 = vsel %vm3866_vm15, %v2855_v48, -1e+30  ;;  %v1021_v49 = vsel %vm3875_vm4, %v2866_v50, -1e+30  ;;  %896 = vmax.xlane.f32.xlu1 %v895_v46  ;;  %vm4789_vm14 = vnez %v4765_v21 }
  0xf9   : > { %v821_v61 = vsel %vm3947_vm13, %v2915_v60, -1e+30  ;;  %v990_v26 = vsel %vm4789_vm14, %v2931_v3, -1e+30  ;;  %v857_v27 = vsel %vm3962_vm10, %v2915_v60, -1e+30  ;;  %v1054_v19 = vmax.f32 %v984_v44, %v985_v40 }
  0xfa   : > { %v890_v32 = vmax.f32 %v889_v59, %v821_v61  ;;  %v852_v36 = vsel %vm3974_vm5, %v2883_v54, -1e+30  ;;  %v1060_v24 = vmax.f32 %v1059_v28, %v990_v26  ;;  %v2649_v16 = vmov -1e+30  }
  0xfb   : > { %vm4790_vm15 = vcmask 15360   ;;  %v935_v54 = vmax.f32 %v934_v5, %v857_v27  ;;  %v929_v10 = vmax.f32 %v928_v7, %v852_v36  ;;  %v1099_v25 = vmax.f32 %v1020_v43, %v1021_v49 }
  0xfc   : > { %418 = vst.msk [vmem:[#allocation2 + $0x8] sm:$0xff] %vm4790_vm15, %v2649_v16  ;;  %vm4791_vm4 = vmmov %vm4790_vm15  ;;  %v1016_v38 = vsel %vm3919_vm9, %v2855_v48, -1e+30  ;;  %v1017_v21 = vsel %vm3934_vm2, %v2866_v50, -1e+30  ;;  %891 = vmax.xlane.f32.xlu0 %v890_v32  ;;  %vm4809_vm9 = vnez %v4783_v23 }
  0xfd   : > { %417 = vst.msk [vmem:[#allocation2] sm:$0xff] %vm4791_vm4, %v2649_v16  ;;  %vm4792_vm12 = vmmov %vm4791_vm4  ;;  %936 = vmax.xlane.f32.xlu1 %v935_v54  ;;  %v1022_v48 = vsel %vm3908_vm11, %v2931_v3, -1e+30  ;;  %v1094_v39 = vmax.f32 %v1016_v38, %v1017_v21  ;;  %v987_v14 = vsel %vm4809_vm9, %v2957_v9, -1e+30  ;;  %vm1120_vm11 = vcmask 7168  }
  0xfe   : > { %419 = vst.msk [vmem:[#allocation2 + $0x10] sm:$0xff] %vm4792_vm12, %v2649_v16  ;;  %vm4793_vm8 = vmmov %vm4791_vm4  ;;  %v1100_v56 = vmax.f32 %v1099_v25, %v1022_v48 }
  0xff   : > { %420 = vst.msk [vmem:[#allocation2 + $0x18] sm:$0xff] %vm4793_vm8, %v2649_v16  ;;  %vm4794_vm1 = vmmov %vm4791_vm4 }
 0x100   : > { %421 = vst.msk [vmem:[#allocation2 + $0x20] sm:$0xff] %vm4794_vm1, %v2649_v16  ;;  %vm4795_vm14 = vmmov %vm4794_vm1 }
 0x101   : > { %422 = vst.msk [vmem:[#allocation2 + $0x28] sm:$0xff] %vm4795_vm14, %v2649_v16  ;;  %vm4796_vm7 = vmmov %vm4794_vm1 }
 0x102   : > { %423 = vst.msk [vmem:[#allocation2 + $0x30] sm:$0xff] %vm4796_vm7, %v2649_v16  ;;  %vm4797_vm3 = vmmov %vm4794_vm1 }
 0x103   : > { %424 = vst.msk [vmem:[#allocation2 + $0x38] sm:$0xff] %vm4797_vm3, %v2649_v16  ;;  %vm4798_vm10 = vmmov %vm4794_vm1  ;;  %vm4805_vm3 = vcmp.eq.s32.totalorder %v3823_v11, %v2872_v52  ;;  %v986_v11 = vsel %vm3836_vm0, %v2931_v3, -1e+30  ;;  %vm4811_vm0 = vnez %v4788_v13  ;;  %v1105_v6 = vld [vmem:[#allocation2 + $0x8] sm:$0xff] }
 0x104   : > { %425 = vst.msk [vmem:[#allocation2 + $0x40] sm:$0xff] %vm4798_vm10, %v2649_v16  ;;  %vm4799_vm5 = vmmov %vm4794_vm1  ;;  %vm4806_vm10 = vcmp.eq.s32.totalorder %v3611_v58, %v2839_v42  ;;  %v991_v42 = vsel %vm3886_vm6, %v2957_v9, -1e+30  ;;  %v1055_v8 = vmax.f32 %v1054_v19, %v986_v11  ;;  %vm4810_vm6 = vnez %v4786_v12  ;;  %v1104_v4 = vld [vmem:[#allocation2] sm:$0xff] }
 0x105   : > { %426 = vst.msk [vmem:[#allocation2 + $0x48] sm:$0xff] %vm4799_vm5, %v2649_v16  ;;  %vm4800_vm13 = vmmov %vm4794_vm1  ;;  %v1061_v58 = vmax.f32 %v1060_v24, %v991_v42  ;;  %v1018_v15 = vsel %vm4811_vm0, %v2931_v3, -1e+30  ;;  %v1106_v26 = vld [vmem:[#allocation2 + $0x10] sm:$0xff] }
 0x106   : > { %427 = vst.msk [vmem:[#allocation2 + $0x50] sm:$0xff] %vm4800_vm13, %v2649_v16  ;;  %vm4801_vm15 = vmmov %vm4794_vm1  ;;  %v1056_v20 = vmax.f32 %v1055_v8, %v987_v14  ;;  %v1095_v63 = vmax.f32 %v1094_v39, %v1018_v15  ;;  %v1107_v5 = vld [vmem:[#allocation2 + $0x18] sm:$0xff] }
 0x107   : > { %428 = vst.msk [vmem:[#allocation2 + $0x58] sm:$0xff] %vm4801_vm15, %v2649_v16  ;;  %vm4802_vm4 = vmmov %vm4794_vm1  ;;  %1062 = vmax.xlane.f32.xlu1 %v1061_v58 }
 0x108   : > { %429 = vst.msk [vmem:[#allocation2 + $0x60] sm:$0xff] %vm4802_vm4, %v2649_v16  ;;  %vm4803_vm12 = vmmov %vm4794_vm1  ;;  %v1109_v11 = vld [vmem:[#allocation2 + $0x28] sm:$0xff] }
 0x109   : > { %430 = vst.msk [vmem:[#allocation2 + $0x68] sm:$0xff] %vm4803_vm12, %v2649_v16  ;;  %vm4804_vm8 = vmmov %vm4794_vm1 }
 0x10a   : > { %431 = vst.msk [vmem:[#allocation2 + $0x70] sm:$0xff] %vm4804_vm8, %v2649_v16  ;;  %vm4028_vm5 = vmand %vm4806_vm10, %vm4805_vm3 }
 0x10b   : > { %432 = vst.msk [vmem:[#allocation2 + $0x78] sm:$0xff] %vm4794_vm1, %v2649_v16  ;;  %v853_v52 = vsel %vm4028_vm5, %v2915_v60, -1e+30  ;;  %v1023_v60 = vsel %vm4810_vm6, %v2957_v9, -1e+30  ;;  %vm4812_vm2 = vmmov %vm4794_vm1  ;;  %v1112_v23 = vld [vmem:[#allocation2 + $0x40] sm:$0xff] }
 0x10c   : > { %v930_v50 = vmax.f32 %v929_v10, %v853_v52  ;;  %v1101_v29 = vmax.f32 %v1100_v56, %v1023_v60  ;;  %v1019_v34 = vsel %vm4028_vm5, %v2957_v9, -1e+30  ;;  %v1113_v17 = vld [vmem:[#allocation2 + $0x48] sm:$0xff]  ;;  %vm4813_vm13 = vmmov %vm4794_vm1 }
 0x10d   : > { %v1096_v47 = vmax.f32 %v1095_v63, %v1019_v34  ;;  %vm4814_vm7 = vmmov %vm4794_vm1  ;;  %v1114_v10 = vld [vmem:[#allocation2 + $0x50] sm:$0xff] }
 0x10e   : > { %931 = vmax.xlane.f32.xlu0 %v930_v50  ;;  %1102 = vmax.xlane.f32.xlu1 %v1101_v29  ;;  %vm4815_vm14 = vmmov %vm4794_vm1  ;;  %v1115_v49 = vld [vmem:[#allocation2 + $0x58] sm:$0xff] }
 0x10f   : > { %vm4816_vm15 = vmmov %vm4794_vm1 }
 0x110   : > { %vm4817_vm4 = vmmov %vm4794_vm1  ;;  %v1117_v60 = vld [vmem:[#allocation2 + $0x68] sm:$0xff] }
 0x111   : > { %vm4818_vm12 = vmmov %vm4794_vm1 }
 0x112   : > { %1057 = vmax.xlane.f32.xlu0 %v1056_v20  ;;  %vm4819_vm8 = vmmov %vm4794_vm1  ;;  %v1108_v20 = vld [vmem:[#allocation2 + $0x20] sm:$0xff] }
 0x113   : > { %vm4820_vm3 = vmmov %vm4794_vm1 }
 0x114   : > { %vm4821_vm10 = vmmov %vm4794_vm1 }
 0x115   : > { %vm4822_vm5 = vmmov %vm4794_vm1 }
 0x116   : > { %1097 = vmax.xlane.f32.xlu0 %v1096_v47  ;;  %vm4823_vm9 = vmmov %vm4794_vm1 }
 0x117   : > { %vm4824_vm6 = vmmov %vm4794_vm1 }
 0x118   : > { %vm4825_vm0 = vmmov %vm4794_vm1 }
 0x14c   : > { %v862_v41 = vpop.xlane.xlu1 %861 }
 0x150   : > { %v907_v18 = vpop.xlane.xlu1 %906  ;;  %v867_v30 = vpop.xlane.xlu0 %866 }
 0x154   : > { %v1033_v57 = vpop.xlane.xlu1 %1032  ;;  %v902_v37 = vpop.xlane.xlu0 %901 }
 0x155   : > { %v1122_v3 = vsel %vm1120_vm11, %v867_v30, %v1033_v57  ;;  %v1116_v30 = vld [vmem:[#allocation2 + $0x60] sm:$0xff] }
 0x156   : > { %v1138_v51 = vmax.f32 %v1105_v6, %v1122_v3 }
 0x158   : > { %1155 = vst.msk [vmem:[#allocation2 + $0x8] sm:$0xff] %vm4812_vm2, %v1138_v51  ;;  %v1073_v31 = vpop.xlane.xlu1 %1072  ;;  %v1028_v33 = vpop.xlane.xlu0 %1027  ;;  %vm4826_vm2 = vmmov %vm4825_vm0 }
 0x159   : > { %v1130_v9 = vsel %vm1120_vm11, %v907_v18, %v1073_v31  ;;  %v1121_v35 = vsel %vm1120_vm11, %v862_v41, %v1028_v33  ;;  %v1111_v31 = vld [vmem:[#allocation2 + $0x38] sm:$0xff] }
 0x15a   : > { %v1146_v22 = vmax.f32 %v1113_v17, %v1130_v9  ;;  %v1137_v55 = vmax.f32 %v1104_v4, %v1121_v35 }
 0x15c   : > { %1163 = vst.msk [vmem:[#allocation2 + $0x48] sm:$0xff] %vm4813_vm13, %v1146_v22  ;;  %v1068_v45 = vpop.xlane.xlu0 %1067 }
 0x15d   : > { %1154 = vst.msk [vmem:[#allocation2] sm:$0xff] %vm4814_vm7, %v1137_v55  ;;  %v1129_v62 = vsel %vm1120_vm11, %v902_v37, %v1068_v45 }
 0x15e   : > { %v877_v59 = vpop.xlane.xlu1 %876  ;;  %v1145_v12 = vmax.f32 %v1112_v23, %v1129_v62  ;;  %v1110_v62 = vld [vmem:[#allocation2 + $0x30] sm:$0xff] }
 0x15f   : > { %v4069_v53 = vld [vmem:[#allocation2 + $0x8] sm:$0xff] }
 0x160   : > { %1162 = vst.msk [vmem:[#allocation2 + $0x40] sm:$0xff] %vm4815_vm14, %v1145_v12  ;;  %1230 = vperm.xlu1 %2488, %v4069_v53   ;;  %v872_v46 = vpop.xlane.xlu0 %871 }
 0x162   : > { %v917_v28 = vpop.xlane.xlu1 %916 }
 0x163   : > { %v4083_v0 = vld [vmem:[#allocation2 + $0x48] sm:$0xff] }
 0x164   : > { %v4073_v13 = vld [vmem:[#allocation2] sm:$0xff]  ;;  %v912_v44 = vpop.xlane.xlu0 %911  ;;  %vm1214_vm13 = vcmp.gt.f32.partialorder %v4083_v0, -5e+29 }
 0x165   : > { %1225 = vperm.xlu0 %2487, %v4073_v13  }
 0x166   : > { %v1043_v7 = vpop.xlane.xlu1 %1042 }
 0x167   : > { %v1124_v40 = vsel %vm1120_vm11, %v877_v59, %v1043_v7  ;;  %v4077_v61 = vld [vmem:[#allocation2 + $0x40] sm:$0xff]  ;;  %v1119_v59 = vld [vmem:[#allocation2 + $0x78] sm:$0xff] }
 0x168   : > { %v1140_v43 = vmax.f32 %v1107_v5, %v1124_v40  ;;  %1265 = vperm.xlu1 %2488, %v4077_v61   ;;  %v1038_v27 = vpop.xlane.xlu0 %1037  ;;  %v1118_v40 = vld [vmem:[#allocation2 + $0x70] sm:$0xff] }
 0x169   : > { %v1123_v24 = vsel %vm1120_vm11, %v872_v46, %v1038_v27 }
 0x16a   : > { %1157 = vst.msk [vmem:[#allocation2 + $0x18] sm:$0xff] %vm4816_vm15, %v1140_v43  ;;  %v1083_v32 = vpop.xlane.xlu1 %1082  ;;  %v1139_v54 = vmax.f32 %v1106_v26, %v1123_v24  ;;  %vm1206_vm15 = vcmp.gt.f32.partialorder %v4069_v53, -5e+29 }
 0x16b   : > { %v1132_v36 = vsel %vm1120_vm11, %v917_v28, %v1083_v32 }
 0x16c   : > { %v1148_v16 = vmax.f32 %v1115_v49, %v1132_v36  ;;  %1156 = vst.msk [vmem:[#allocation2 + $0x10] sm:$0xff] %vm4818_vm12, %v1139_v54  ;;  %1270 = vperm.xlu1 %2488, %v4083_v0   ;;  %v1078_v25 = vpop.xlane.xlu0 %1077  ;;  %v1189_v54 = vsub.f32 0.0, %v4073_v13  ;;  %vm1213_vm12 = vcmp.gt.f32.partialorder %v4077_v61, -5e+29 }
 0x16d   : > { %v1131_v38 = vsel %vm1120_vm11, %v912_v44, %v1078_v25  ;;  %v1484_v25 = vsel %vm1214_vm13, 1, %v2648_v2 }
 0x16e   : > { %1165 = vst.msk [vmem:[#allocation2 + $0x58] sm:$0xff] %vm4817_vm4, %v1148_v16  ;;  %v887_v19 = vpop.xlane.xlu1 %886  ;;  %v1147_v21 = vmax.f32 %v1114_v10, %v1131_v38  ;;  %v1197_v38 = vsub.f32 0.0, %v4077_v61 }
 0x170   : > { %1164 = vst.msk [vmem:[#allocation2 + $0x50] sm:$0xff] %vm4819_vm8, %v1147_v21  ;;  %v882_v58 = vpop.xlane.xlu0 %881  ;;  %v1198_v21 = vsub.f32 0.0, %v4083_v0 }
 0x171   : > { %v4089_v42 = vld [vmem:[#allocation2 + $0x18] sm:$0xff] }
 0x172   : > { %v927_v52 = vpop.xlane.xlu1 %926  ;;  %1240 = vperm.xlu0 %2487, %v4089_v42   ;;  %v1192_v16 = vsub.f32 0.0, %v4089_v42 }
 0x173   : > { %v4095_v50 = vld [vmem:[#allocation2 + $0x10] sm:$0xff] }
 0x174   : > { %1235 = vperm.xlu1 %2488, %v4095_v50   ;;  %vm1207_vm7 = vcmp.gt.f32.partialorder %v4095_v50, -5e+29 }
 0x175   : > { %v4093_v48 = vld [vmem:[#allocation2 + $0x58] sm:$0xff] }
 0x176   : > { %v1053_v8 = vpop.xlane.xlu1 %1052  ;;  %1280 = vperm.xlu0 %2487, %v4093_v48   ;;  %vm1216_vm14 = vcmp.gt.f32.partialorder %v4093_v48, -5e+29  ;;  %v1200_v0 = vsub.f32 0.0, %v4093_v48 }
 0x177   : > { %v1126_v39 = vsel %vm1120_vm11, %v887_v19, %v1053_v8  ;;  %v4100_v15 = vld [vmem:[#allocation2 + $0x50] sm:$0xff]  ;;  %v1190_v19 = vsub.f32 0.0, %v4069_v53  ;;  %v1486_v8 = vsel %vm1216_vm14, 1, %v2648_v2  ;;  %v1483_v53 = vsel %vm1213_vm12, 1, %v2648_v2 }
 0x178   : > { %v922_v56 = vpop.xlane.xlu0 %921  ;;  %v1142_v14 = vmax.f32 %v1109_v11, %v1126_v39  ;;  %1275 = vperm.xlu1 %2488, %v4100_v15   ;;  %v1199_v11 = vsub.f32 0.0, %v4100_v15  ;;  %v1476_v39 = vsel %vm1206_vm15, 1, %v2648_v2 }
 0x17a   : > { %1159 = vst.msk [vmem:[#allocation2 + $0x28] sm:$0xff] %vm4794_vm1, %v1142_v14  ;;  %v1093_v29 = vpop.xlane.xlu1 %1092 }
 0x17b   : > { %v1134_v34 = vsel %vm1120_vm11, %v927_v52, %v1093_v29  ;;  %v1477_v52 = vsel %vm1207_vm7, 1, %v2648_v2  ;;  %v2501_v29 = vld [vmem:[%s4630_s5 + $0x18] sm:$0xff]   ;;  %vm1611_vm7 = vcmask 523264  }
 0x17c   : > { %v1048_v63 = vpop.xlane.xlu0 %1047  ;;  %v1150_v41 = vmax.f32 %v1117_v60, %v1134_v34  ;;  %2385 = vmatprep.subr.bf16.mxu0 %v2501_v29  ;;  %2409 = vmatprep.subr.bf16.mxu1 %v2501_v29 }
 0x17d   : > { %v1125_v47 = vsel %vm1120_vm11, %v882_v58, %v1048_v63  ;;  %v1191_v58 = vsub.f32 0.0, %v4095_v50  ;;  %v2502_v63 = vld [vmem:[%s4630_s5 + $0x10] sm:$0xff]   ;;  %2386 = vmatpush3.bf16.msra.mxu0 %v2501_v29  ;;  %2413 = vmatpush3.bf16.msra.mxu1 %v2501_v29  ;;  %v4301_v29 = vld [vmem:[%s4629_s4] ss:$0 sm:$0xff] }
 0x17e   : > { %v1141_v18 = vmax.f32 %v1108_v20, %v1125_v47  ;;  %1167 = vst.msk [vmem:[#allocation2 + $0x68] sm:$0xff] %vm4820_vm3, %v1150_v41  ;;  %2387 = vmatprep.subr.bf16.mxu0 %v2502_v63  ;;  %2410 = vmatprep.subr.bf16.mxu1 %v2502_v63  ;;  %v2503_v47 = vld [vmem:[%s4630_s5 + $0x8] sm:$0xff]   ;;  %v2504_v41 = vld [vmem:[%s4630_s5] sm:$0xff]  }
 0x180   : > { %1158 = vst.msk [vmem:[#allocation2 + $0x20] sm:$0xff] %vm4821_vm10, %v1141_v18  ;;  %v1088_v57 = vpop.xlane.xlu0 %1087  ;;  %vm1208_vm10 = vcmp.gt.f32.partialorder %v4089_v42, -5e+29 }
 0x181   : > { %v897_v6 = vpop.xlane.xlu1 %896  ;;  %v1133_v37 = vsel %vm1120_vm11, %v922_v56, %v1088_v57  ;;  %v4109_v51 = vld [vmem:[#allocation2 + $0x28] sm:$0xff]  ;;  %2388 = vmatpush3.bf16.msra.mxu0 %v2502_v63  ;;  %2414 = vmatpush3.bf16.msra.mxu1 %v2502_v63  ;;  %v1478_v18 = vsel %vm1208_vm10, 1, %v2648_v2 }
 0x182   : > { %v1149_v3 = vmax.f32 %v1116_v30, %v1133_v37  ;;  %1250 = vperm.xlu0 %2487, %v4109_v51   ;;  %2389 = vmatprep.subr.bf16.mxu0 %v2503_v47 }
 0x183   : > { %2411 = vmatprep.subr.bf16.mxu1 %v2503_v47 }
 0x184   : > { %1166 = vst.msk [vmem:[#allocation2 + $0x60] sm:$0xff] %vm4822_vm5, %v1149_v3  ;;  %vm1215_vm5 = vcmp.gt.f32.partialorder %v4100_v15, -5e+29 }
 0x185   : > { %v892_v4 = vpop.xlane.xlu0 %891  ;;  %v4113_v33 = vld [vmem:[#allocation2 + $0x68] sm:$0xff]  ;;  %2390 = vmatpush3.bf16.msra.mxu0 %v2503_v47  ;;  %2415 = vmatpush3.bf16.msra.mxu1 %v2503_v47  ;;  %v1485_v42 = vsel %vm1215_vm5, 1, %v2648_v2 }
 0x186   : > { %v937_v17 = vpop.xlane.xlu1 %936  ;;  %1290 = vperm.xlu0 %2487, %v4113_v33   ;;  %vm1218_vm8 = vcmp.gt.f32.partialorder %v4113_v33, -5e+29  ;;  %v1202_v34 = vsub.f32 0.0, %v4113_v33  ;;  %2391 = vmatprep.subr.bf16.mxu0 %v2504_v41  ;;  %v1736_v33 = vld [vmem:[%s4220_s21 + $0x18] sm:$0xff] }
 0x187   : > { %v4115_v9 = vld [vmem:[#allocation2 + $0x20] sm:$0xff]  ;;  %v1488_v48 = vsel %vm1218_vm8, 1, %v2648_v2  ;;  %2412 = vmatprep.subr.bf16.mxu1 %v2504_v41 }
 0x188   : > { %1245 = vperm.xlu1 %2488, %v4115_v9   ;;  %vm1209_vm4 = vcmp.gt.f32.partialorder %v4115_v9, -5e+29  ;;  %v1193_v14 = vsub.f32 0.0, %v4115_v9 }
 0x189   : > { %v1479_v50 = vsel %vm1209_vm4, 1, %v2648_v2  ;;  %2392 = vmatpush3.bf16.msra.mxu0 %v2504_v41  ;;  %2416 = vmatpush3.bf16.msra.mxu1 %v2504_v41 }
 0x18b   : > { %v4120_v45 = vld [vmem:[#allocation2 + $0x60] sm:$0xff] }
 0x18c   : > { %1285 = vperm.xlu1 %2488, %v4120_v45   ;;  %v1201_v61 = vsub.f32 0.0, %v4120_v45 }
 0x190   : > { %v1063_v35 = vpop.xlane.xlu1 %1062 }
 0x191   : > { %v1128_v55 = vsel %vm1120_vm11, %v897_v6, %v1063_v35  ;;  %v1735_v35 = vld [vmem:[%s4220_s21 + $0x10] sm:$0xff] }
 0x192   : > { %v1144_v23 = vmax.f32 %v1111_v31, %v1128_v55  ;;  %v1734_v31 = vld [vmem:[%s4220_s21 + $0x8] sm:$0xff]  ;;  %v1737_v55 = vld [vmem:[%s4220_s21 + $0x20] sm:$0xff] }
 0x194   : > { %1161 = vst.msk [vmem:[#allocation2 + $0x38] sm:$0xff] %vm4823_vm9, %v1144_v23  ;;  %vm1210_vm9 = vcmp.gt.f32.partialorder %v4109_v51, -5e+29  ;;  %v1740_v23 = vld [vmem:[%s4220_s21 + $0x38] sm:$0xff] }
 0x195   : > { %v1480_v57 = vsel %vm1210_vm9, 1, %v2648_v2 }
 0x197   : > { %v932_v22 = vpop.xlane.xlu0 %931  ;;  %v1103_v12 = vpop.xlane.xlu1 %1102 }
 0x198   : > { %v1136_v46 = vsel %vm1120_vm11, %v937_v17, %v1103_v12  ;;  %v1741_v12 = vld [vmem:[%s4220_s21 + $0x40] sm:$0xff] }
 0x199   : > { %v1152_v7 = vmax.f32 %v1119_v59, %v1136_v46  ;;  %v1739_v59 = vld [vmem:[%s4220_s21 + $0x30] sm:$0xff]  ;;  %v1744_v46 = vld [vmem:[%s4220_s21 + $0x58] sm:$0xff] }
 0x19b   : > { %v1058_v28 = vpop.xlane.xlu0 %1057  ;;  %1169 = vst.msk [vmem:[#allocation2 + $0x78] sm:$0xff] %vm4824_vm6, %v1152_v7  ;;  %v4129_v32 = vld [vmem:[#allocation2 + $0x38] sm:$0xff]  ;;  %vm1217_vm6 = vcmp.gt.f32.partialorder %v4120_v45, -5e+29  ;;  %v1743_v7 = vld [vmem:[%s4220_s21 + $0x50] sm:$0xff] }
 0x19c   : > { %v1127_v5 = vsel %vm1120_vm11, %v892_v4, %v1058_v28  ;;  %1260 = vperm.xlu0 %2487, %v4129_v32   ;;  %v1196_v56 = vsub.f32 0.0, %v4129_v32  ;;  %vm1212_vm1 = vcmp.gt.f32.partialorder %v4129_v32, -5e+29  ;;  %v1487_v37 = vsel %vm1217_vm6, 1, %v2648_v2  ;;  %v1733_v4 = vld [vmem:[%s4220_s21] sm:$0xff] }
 0x19d   : > { %v1143_v44 = vmax.f32 %v1110_v62, %v1127_v5  ;;  %v1482_v60 = vsel %vm1212_vm1, 1, %v2648_v2  ;;  %v1742_v62 = vld [vmem:[%s4220_s21 + $0x48] sm:$0xff] }
 0x19f   : > { %1160 = vst.msk [vmem:[#allocation2 + $0x30] sm:$0xff] %vm4825_vm0, %v1143_v44  ;;  %v1098_v43 = vpop.xlane.xlu0 %1097  ;;  %v1746_v44 = vld [vmem:[%s4220_s21 + $0x68] sm:$0xff] }
 0x1a0   : > { %v1135_v49 = vsel %vm1120_vm11, %v932_v22, %v1098_v43  ;;  %vm1205_vm11 = vcmp.gt.f32.partialorder %v4073_v13, -5e+29  ;;  %v1194_v13 = vsub.f32 0.0, %v4109_v51  ;;  %v1738_v22 = vld [vmem:[%s4220_s21 + $0x28] sm:$0xff] }
 0x1a1   : > { %v1151_v26 = vmax.f32 %v1118_v40, %v1135_v49  ;;  %v1475_v10 = vsel %vm1205_vm11, 1, %v2648_v2  ;;  %v1745_v49 = vld [vmem:[%s4220_s21 + $0x60] sm:$0xff] }
 0x1a2   : > { %v4133_v27 = vld [vmem:[#allocation2 + $0x78] sm:$0xff] }
 0x1a3   : > { %1168 = vst.msk [vmem:[#allocation2 + $0x70] sm:$0xff] %vm4826_vm2, %v1151_v26  ;;  %1300 = vperm.xlu0 %2487, %v4133_v27   ;;  %vm1220_vm3 = vcmp.gt.f32.partialorder %v4133_v27, -5e+29  ;;  %v1204_v15 = vsub.f32 0.0, %v4133_v27  ;;  %v1748_v26 = vld [vmem:[%s4220_s21 + $0x78] sm:$0xff]  ;;  %v1747_v27 = vld [vmem:[%s4220_s21 + $0x70] sm:$0xff] }
 0x1a4   : > { %v1490_v20 = vsel %vm1220_vm3, 1, %v2648_v2  ;;  %s2229_s21 = sshll.u32 %s4506_s17, 4  ;;  %s4572_s21 = int_to_ptr.vmem [resolvable:$true] %s2229_s21 }
 0x1a5   : > { %s2569_s27 = scalar_lea.vmem %s4572_s21, 2048  ;;  %p2576_p1 = scmp.lt.s32.totalorder %s4572_s21, %s2574_s29 }
 0x1a6   : > { %v4135_v36 = vld [vmem:[#allocation2 + $0x30] sm:$0xff]  ;;  %p2570_p12 = scmp.ne.s32.totalorder %s4572_s21, %s2569_s27  ;;  %p2577_p2 = scmp.lt.s32.totalorder %s2575_s30, %s2569_s27 }
 0x1a7   : > { %1255 = vperm.xlu1 %2488, %v4135_v36   ;;  %2490 = vset.pattern.permute.xlu0 %v2647_v1  ;;  %v1195_v30 = vsub.f32 0.0, %v4135_v36  ;;  %vm1211_vm0 = vcmp.gt.f32.partialorder %v4135_v36, -5e+29 }
 0x1a8   : > { %1342 = vperm.xlu0 %2490, %v1192_v16   ;;  %v1481_v3 = vsel %vm1211_vm0, 1, %v2648_v2  ;;  %v2365_v16 = vld [vmem:[%s4632_s7] ss:$0 sm:$0xff]  ;;  %p2571_p13 = pnand %p2570_p12, %p2747_p4  ;;  %p2578_p3 = por %p2577_p2, %p2576_p1 }
 0x1aa   : > { %v4139_v24 = vld [vmem:[#allocation2 + $0x70] sm:$0xff]  ;;  %p2572_p0 = pneg %p2571_p13 }
 0x1ab   : > { %1295 = vperm.xlu1 %2488, %v4139_v24   ;;  %v1203_v6 = vsub.f32 0.0, %v4139_v24  ;;  %vm1219_vm2 = vcmp.gt.f32.partialorder %v4139_v24, -5e+29 }
 0x1ac   : > { %2491 = vset.pattern.permute.xlu0 %v2648_v2  ;;  %v1489_v17 = vsel %vm1219_vm2, 1, %v2648_v2  ;;  %p2579_p5 = pnand %p2578_p3, %p2572_p0 }
 0x1ad   : > { %1492 = vperm.xlu0 %2491, %v1475_v10  }
 0x1af   : > { %2489 = vset.pattern.permute.xlu1 %v2647_v1 }
 0x1b0   : > { %1327 = vperm.xlu1 %2489, %v1189_v54  }
 0x1b1   : > { %1519 = vperm.xlu0 %2491, %v1484_v25  }
 0x1b4   : > { %1332 = vperm.xlu1 %2489, %v1190_v19  }
 0x1b5   : > { %2494 = vset.pattern.permute.xlu0 %v2647_v1 }
 0x1b6   : > { %1352 = vperm.xlu0 %2494, %v1194_v13  }
 0x1b8   : > { %1367 = vperm.xlu1 %2489, %v1197_v38  }
 0x1ba   : > { %2495 = vset.pattern.permute.xlu0 %v2648_v2 }
 0x1bb   : > { %1498 = vperm.xlu0 %2495, %v1477_v52  }
 0x1bc   : > { %1372 = vperm.xlu1 %2489, %v1198_v21  }
 0x1bf   : > { %1525 = vperm.xlu0 %2495, %v1486_v8  }
 0x1c0   : > { %1337 = vperm.xlu1 %2489, %v1191_v58   ;;  %v4288_v58 = vld [vmem:[%s4628_s3] ss:$0 sm:$0xff] }
 0x1c3   : > { %2498 = vset.pattern.permute.xlu0 %v2647_v1 }
 0x1c4   : > { %1377 = vperm.xlu1 %2489, %v1199_v11   ;;  %1362 = vperm.xlu0 %2498, %v1196_v56  }
 0x1c8   : > { %1382 = vperm.xlu1 %2489, %v1200_v0   ;;  %2499 = vset.pattern.permute.xlu0 %v2648_v2 }
 0x1c9   : > { %1504 = vperm.xlu0 %2499, %v1479_v50  }
 0x1cc   : > { %2492 = vset.pattern.permute.xlu1 %v2648_v2 }
 0x1cd   : > { %1495 = vperm.xlu1 %2492, %v1476_v39   ;;  %1531 = vperm.xlu0 %2499, %v1488_v48  }
 0x1d1   : > { %1516 = vperm.xlu1 %2492, %v1483_v53   ;;  %1513 = vperm.xlu0 %2499, %v1482_v60  }
 0x1d5   : > { %2493 = vset.pattern.permute.xlu1 %v2647_v1  ;;  %1537 = vperm.xlu0 %2499, %v1490_v20  }
 0x1d6   : > { %1347 = vperm.xlu1 %2493, %v1193_v14  }
 0x1d9   : > { %1767 = vrot.lane.b32.xlu0 %v1734_v31, %s2650_s24 }
 0x1da   : > { %1387 = vperm.xlu1 %2493, %v1201_v61  }
 0x1dd   : > { %1771 = vrot.lane.b32.xlu0 %v1736_v33, %s2650_s24 }
 0x1de   : > { %1392 = vperm.xlu1 %2493, %v1202_v34  }
 0x1e0   : > { %v1226_v5 = vpop.permute.xlu0 %1225 }
 0x1e1   : > { %1775 = vrot.lane.b32.xlu0 %v1738_v22, %s2650_s24  ;;  %v1309_v0 = vmul.f32 %v4288_v58, %v1226_v5 }
 0x1e2   : > { %2496 = vset.pattern.permute.xlu1 %v2648_v2 }
 0x1e3   : > { %1501 = vperm.xlu1 %2496, %v1478_v18  }
 0x1e5   : > { %1779 = vrot.lane.b32.xlu0 %v1740_v23, %s2650_s24 }
 0x1e7   : > { %1522 = vperm.xlu1 %2496, %v1485_v42  }
 0x1e9   : > { %1783 = vrot.lane.b32.xlu0 %v1742_v62, %s2650_s24 }
 0x1eb   : > { %2497 = vset.pattern.permute.xlu1 %v2647_v1  ;;  %v4211_v1 = vpop.permute.xlu1 %1230 }
 0x1ec   : > { %1357 = vperm.xlu1 %2497, %v1195_v30   ;;  %v1310_v50 = vmul.f32 %v4288_v58, %v4211_v1 }
 0x1ed   : > { %1787 = vrot.lane.b32.xlu0 %v1744_v46, %s2650_s24  ;;  %v4256_v40 = vpop.permute.xlu0 %1240 }
 0x1ee   : > { %v1312_v46 = vmul.f32 %v4288_v58, %v4256_v40 }
 0x1ef   : > { %v4222_v51 = vpop.permute.xlu1 %1265 }
 0x1f0   : > { %1397 = vperm.xlu1 %2497, %v1203_v6   ;;  %v1317_v63 = vmul.f32 %v4288_v58, %v4222_v51 }
 0x1f1   : > { %1791 = vrot.lane.b32.xlu0 %v1746_v44, %s2650_s24  ;;  %v4268_v36 = vpop.permute.xlu0 %1280 }
 0x1f3   : > { %v1271_v9 = vpop.permute.xlu1 %1270 }
 0x1f4   : > { %1402 = vperm.xlu1 %2497, %v1204_v15   ;;  %v1318_v60 = vmul.f32 %v4288_v58, %v1271_v9 }
 0x1f5   : > { %1795 = vrot.lane.b32.xlu0 %v1748_v26, %s2650_s24  ;;  %v1320_v26 = vmul.f32 %v4288_v58, %v4268_v36 }
 0x1f8   : > { %2500 = vset.pattern.permute.xlu1 %v2648_v2  ;;  %v4234_v2 = vpop.permute.xlu1 %1235 }
 0x1f9   : > { %1507 = vperm.xlu1 %2500, %v1480_v57   ;;  %v1311_v62 = vmul.f32 %v4288_v58, %v4234_v2 }
 0x1fc   : > { %v4242_v45 = vpop.permute.xlu1 %1275 }
 0x1fd   : > { %1528 = vperm.xlu1 %2500, %v1487_v37   ;;  %v4276_v54 = vpop.permute.xlu0 %1250 }
 0x201   : > { %1510 = vperm.xlu1 %2500, %v1481_v3   ;;  %v4279_v19 = vpop.permute.xlu0 %1290 }
 0x203   : > { %v4248_v28 = vpop.permute.xlu1 %1245 }
 0x205   : > { %1534 = vperm.xlu1 %2500, %v1489_v17  }
 0x207   : > { %v4258_v43 = vpop.permute.xlu1 %1285 }
 0x209   : > { %1765 = vrot.lane.b32.xlu1 %v1733_v4, %s2650_s24 }
 0x20d   : > { %1769 = vrot.lane.b32.xlu1 %v1735_v35, %s2650_s24 }
 0x211   : > { %1773 = vrot.lane.b32.xlu1 %v1737_v55, %s2650_s24 }
 0x215   : > { %1777 = vrot.lane.b32.xlu1 %v1739_v59, %s2650_s24 }
 0x217   : > { %v4281_v38 = vpop.permute.xlu0 %1260 }
 0x219   : > { %1781 = vrot.lane.b32.xlu1 %v1741_v12, %s2650_s24 }
 0x21d   : > { %1785 = vrot.lane.b32.xlu1 %v1743_v7, %s2650_s24 }
 0x21e   : > { %v4283_v52 = vpop.permute.xlu0 %1300 }
 0x221   : > { %1789 = vrot.lane.b32.xlu1 %v1745_v49, %s2650_s24 }
 0x222   : > { %v4264_v32 = vpop.permute.xlu1 %1255 }
 0x223   : > { %v1343_v39 = vpop.permute.xlu0 %1342 }
 0x224   : > { %v1408_v12 = vmul.f32 %v4288_v58, %v1343_v39 }
 0x225   : > { %1793 = vrot.lane.b32.xlu1 %v1747_v27, %s2650_s24 }
 0x226   : > { %v4271_v24 = vpop.permute.xlu1 %1295  ;;  %v1424_v27 = vmax.f32 %v1312_v46, %v1408_v12  ;;  %v1324_v12 = vmul.f32 %v4288_v58, %v4283_v52 }
 0x228   : > { %v1493_v18 = vpop.permute.xlu0 %1492 }
 0x229   : > { %1851 = vrot.lane.b32.xlu1 %v2365_v16, %s2650_s24  ;;  %vm1539_vm11 = vcmp.eq.s32.totalorder %v1493_v18, 1 }
 0x22b   : > { %v1328_v10 = vpop.permute.xlu1 %1327 }
 0x22c   : > { %v1405_v11 = vmul.f32 %v4288_v58, %v1328_v10  ;;  %v1520_v17 = vpop.permute.xlu0 %1519  ;;  %v1319_v10 = vmul.f32 %v4288_v58, %v4242_v45 }
 0x22d   : > { %vm1548_vm14 = vcmp.eq.s32.totalorder %v1520_v17, 1 }
 0x22e   : > { %v1421_v48 = vmax.f32 %v1309_v0, %v1405_v11  ;;  %v1446_v11 = vadd.f32 %v4301_v29, %v1424_v27 }
 0x22f   : > { %v1333_v25 = vpop.permute.xlu1 %1332 }
 0x230   : > { %v1406_v56 = vmul.f32 %v4288_v58, %v1333_v25  ;;  %v1443_v34 = vadd.f32 %v4301_v29, %v1421_v48 }
 0x231   : > { %v1353_v5 = vpop.permute.xlu0 %1352 }
 0x232   : > { %v1422_v61 = vmax.f32 %v1310_v50, %v1406_v56  ;;  %v1459_v6 = vmax.f32 %v1443_v34, 0.0  ;;  %v1462_v50 = vmax.f32 %v1446_v11, 0.0  ;;  %v1410_v18 = vmul.f32 %v4288_v58, %v1353_v5 }
 0x233   : > { %v1368_v13 = vpop.permute.xlu1 %1367 }
 0x234   : > { %v1413_v20 = vmul.f32 %v4288_v58, %v1368_v13  ;;  %v1444_v30 = vadd.f32 %v4301_v29, %v1422_v61  ;;  %v1555_v3 = vsel %vm1539_vm11, %v1459_v6, 0.0  ;;  %v1314_v6 = vmul.f32 %v4288_v58, %v4276_v54 }
 0x236   : > { %v1429_v42 = vmax.f32 %v1317_v63, %v1413_v20  ;;  %v1460_v57 = vmax.f32 %v1444_v30, 0.0  ;;  %v1313_v30 = vmul.f32 %v4288_v58, %v4248_v28 }
 0x237   : > { %v1373_v21 = vpop.permute.xlu1 %1372 }
 0x238   : > { %v1414_v53 = vmul.f32 %v4288_v58, %v1373_v21  ;;  %v1451_v1 = vadd.f32 %v4301_v29, %v1429_v42  ;;  %v1499_v21 = vpop.permute.xlu0 %1498 }
 0x239   : > { %vm1541_vm4 = vcmp.eq.s32.totalorder %v1499_v21, 1 }
 0x23a   : > { %v1430_v47 = vmax.f32 %v1318_v60, %v1414_v53  ;;  %v1467_v33 = vmax.f32 %v1451_v1, 0.0 }
 0x23b   : > { %v1338_v8 = vpop.permute.xlu1 %1337 }
 0x23c   : > { %v1452_v15 = vadd.f32 %v4301_v29, %v1430_v47  ;;  %v1407_v23 = vmul.f32 %v4288_v58, %v1338_v8  ;;  %v1526_v39 = vpop.permute.xlu0 %1525 }
 0x23d   : > { %vm1550_vm8 = vcmp.eq.s32.totalorder %v1526_v39, 1 }
 0x23e   : > { %v1468_v4 = vmax.f32 %v1452_v15, 0.0  ;;  %v1423_v7 = vmax.f32 %v1311_v62, %v1407_v23 }
 0x23f   : > { %v1378_v14 = vpop.permute.xlu1 %1377 }
 0x240   : > { %v1564_v22 = vsel %vm1548_vm14, %v1468_v4, 0.0  ;;  %v1415_v16 = vmul.f32 %v4288_v58, %v1378_v14  ;;  %v1445_v2 = vadd.f32 %v4301_v29, %v1423_v7  ;;  %v1363_v47 = vpop.permute.xlu0 %1362  ;;  %v1321_v4 = vmul.f32 %v4288_v58, %v4258_v43 }
 0x241   : > { %vm2182_vm14 = vcmask 531456  }
 0x242   : > { %v1431_v40 = vmax.f32 %v1319_v10, %v1415_v16  ;;  %v1461_v0 = vmax.f32 %v1445_v2, 0.0 }
 0x243   : > { %v1383_v41 = vpop.permute.xlu1 %1382 }
 0x244   : > { %v1416_v44 = vmul.f32 %v4288_v58, %v1383_v41  ;;  %v1453_v36 = vadd.f32 %v4301_v29, %v1431_v40  ;;  %v1557_v45 = vsel %vm1541_vm4, %v1461_v0, 0.0  ;;  %v1505_v17 = vpop.permute.xlu0 %1504 }
 0x245   : > { %vm1543_vm3 = vcmp.eq.s32.totalorder %v1505_v17, 1 }
 0x246   : > { %v1432_v25 = vmax.f32 %v1320_v26, %v1416_v44  ;;  %v1469_v60 = vmax.f32 %v1453_v36, 0.0 }
 0x248   : > { %v1496_v37 = vpop.permute.xlu1 %1495  ;;  %v1454_v8 = vadd.f32 %v4301_v29, %v1432_v25  ;;  %v1532_v23 = vpop.permute.xlu0 %1531 }
 0x249   : > { %vm1540_vm13 = vcmp.eq.s32.totalorder %v1496_v37, 1  ;;  %v1426_v37 = vmax.f32 %v1314_v6, %v1410_v18  ;;  %vm1552_vm5 = vcmp.eq.s32.totalorder %v1532_v23, 1 }
 0x24a   : > { %v1556_v51 = vsel %vm1540_vm13, %v1460_v57, 0.0  ;;  %v1470_v48 = vmax.f32 %v1454_v8, 0.0  ;;  %vm1934_vm13 = vcmask 261120  }
 0x24b   : > { %v1571_v31 = vpack.c.bf16 %v1556_v51, %v1555_v3  ;;  %v1322_v3 = vmul.f32 %v4288_v58, %v4279_v19  ;;  %v1448_v54 = vadd.f32 %v4301_v29, %v1426_v37  ;;  %v1316_v19 = vmul.f32 %v4288_v58, %v4281_v38 }
 0x24c   : > { %v1517_v9 = vpop.permute.xlu1 %1516  ;;  %v1566_v63 = vsel %vm1550_vm8, %v1470_v48, 0.0  ;;  %v1514_v25 = vpop.permute.xlu0 %1513 }
 0x24d   : > { %vm1547_vm15 = vcmp.eq.s32.totalorder %v1517_v9, 1  ;;  %2393 = vmatprep.mubr.msk.bf16.mxu0 %vm1611_vm7, %v1571_v31  ;;  %v1412_v9 = vmul.f32 %v4288_v58, %v1363_v47  ;;  %v1464_v46 = vmax.f32 %v1448_v54, 0.0  ;;  %vm1546_vm6 = vcmp.eq.s32.totalorder %v1514_v25, 1 }
 0x24e   : > { %v1563_v35 = vsel %vm1547_vm15, %v1467_v33, 0.0 }
 0x24f   : > { %v1575_v55 = vpack.c.bf16 %v1564_v22, %v1563_v35  ;;  %v1428_v5 = vmax.f32 %v1316_v19, %v1412_v9 }
 0x251   : > { %v1348_v59 = vpop.permute.xlu1 %1347  ;;  %2401 = vmatprep.mubr.msk.bf16.mxu1 %vm1611_vm7, %v1575_v55  ;;  %v1315_v55 = vmul.f32 %v4288_v58, %v4264_v32  ;;  %v1323_v32 = vmul.f32 %v4288_v58, %v4271_v24  ;;  %v1450_v52 = vadd.f32 %v4301_v29, %v1428_v5 }
 0x252   : > { %v1409_v41 = vmul.f32 %v4288_v58, %v1348_v59 }
 0x254   : > { %v1425_v15 = vmax.f32 %v1313_v30, %v1409_v41 }
 0x255   : > { %v1388_v49 = vpop.permute.xlu1 %1387 }
 0x256   : > { %v1417_v51 = vmul.f32 %v4288_v58, %v1388_v49  ;;  %v1447_v31 = vadd.f32 %v4301_v29, %v1425_v15 }
 0x258   : > { %v1433_v35 = vmax.f32 %v1321_v4, %v1417_v51  ;;  %v1463_v59 = vmax.f32 %v1447_v31, 0.0 }
 0x259   : > { %v1393_v13 = vpop.permute.xlu1 %1392 }
 0x25a   : > { %v1418_v57 = vmul.f32 %v4288_v58, %v1393_v13  ;;  %v1455_v38 = vadd.f32 %v4301_v29, %v1433_v35  ;;  %v1559_v16 = vsel %vm1543_vm3, %v1463_v59, 0.0 }
 0x25c   : > { %v1434_v28 = vmax.f32 %v1322_v3, %v1418_v57  ;;  %v1471_v21 = vmax.f32 %v1455_v38, 0.0 }
 0x25e   : > { %v1502_v56 = vpop.permute.xlu1 %1501  ;;  %v1456_v43 = vadd.f32 %v4301_v29, %v1434_v28 }
 0x25f   : > { %vm1542_vm12 = vcmp.eq.s32.totalorder %v1502_v56, 1  ;;  %v1466_v56 = vmax.f32 %v1450_v52, 0.0 }
 0x260   : > { %v1558_v53 = vsel %vm1542_vm12, %v1462_v50, 0.0  ;;  %v1472_v26 = vmax.f32 %v1456_v43, 0.0 }
 0x261   : > { %v1572_v14 = vpack.c.bf16 %v1558_v53, %v1557_v45  ;;  %v1562_v48 = vsel %vm1546_vm6, %v1466_v56, 0.0  ;;  %v1538_v45 = vpop.permute.xlu0 %1537 }
 0x262   : > { %v1523_v61 = vpop.permute.xlu1 %1522  ;;  %v1568_v8 = vsel %vm1552_vm5, %v1472_v26, 0.0  ;;  %vm1554_vm2 = vcmp.eq.s32.totalorder %v1538_v45, 1 }
 0x263   : > { %vm1549_vm1 = vcmp.eq.s32.totalorder %v1523_v61, 1  ;;  %2394 = vmatmul.mubr.msk.bf16.vlgmr.msra.gmra.mxu0 %vm1611_vm7, %v1572_v14 }
 0x264   : > { %v1565_v20 = vsel %vm1549_vm1, %v1469_v60, 0.0 }
 0x265   : > { %v1576_v34 = vpack.c.bf16 %v1566_v63, %v1565_v20  ;;  %v1768_v30 = vpop.permute.xlu0 %1767 }
 0x267   : > { %v1358_v42 = vpop.permute.xlu1 %1357  ;;  %2402 = vmatmul.mubr.msk.bf16.vlgmr.msra.gmra.mxu1 %vm1611_vm7, %v1576_v34 }
 0x268   : > { %v1411_v22 = vmul.f32 %v4288_v58, %v1358_v42 }
 0x269   : > { %v1772_v15 = vpop.permute.xlu0 %1771 }
 0x26a   : > { %v1427_v7 = vmax.f32 %v1315_v55, %v1411_v22 }
 0x26b   : > { %v1398_v1 = vpop.permute.xlu1 %1397 }
 0x26c   : > { %v1419_v44 = vmul.f32 %v4288_v58, %v1398_v1  ;;  %v1449_v11 = vadd.f32 %v4301_v29, %v1427_v7 }
 0x26d   : > { %v1776_v37 = vpop.permute.xlu0 %1775 }
 0x26e   : > { %v1435_v13 = vmax.f32 %v1323_v32, %v1419_v44  ;;  %v1465_v50 = vmax.f32 %v1449_v11, 0.0 }
 0x26f   : > { %v1403_v33 = vpop.permute.xlu1 %1402 }
 0x270   : > { %v1420_v62 = vmul.f32 %v4288_v58, %v1403_v33  ;;  %v1457_v39 = vadd.f32 %v4301_v29, %v1435_v13 }
 0x271   : > { %v1780_v3 = vpop.permute.xlu0 %1779 }
 0x272   : > { %v1436_v27 = vmax.f32 %v1324_v12, %v1420_v62  ;;  %v1473_v61 = vmax.f32 %v1457_v39, 0.0 }
 0x274   : > { %v1508_v49 = vpop.permute.xlu1 %1507  ;;  %v1458_v24 = vadd.f32 %v4301_v29, %v1436_v27 }
 0x275   : > { %vm1544_vm10 = vcmp.eq.s32.totalorder %v1508_v49, 1  ;;  %v1784_v31 = vpop.permute.xlu0 %1783 }
 0x276   : > { %v1560_v10 = vsel %vm1544_vm10, %v1464_v46, 0.0  ;;  %v1474_v53 = vmax.f32 %v1458_v24, 0.0 }
 0x277   : > { %v1573_v2 = vpack.c.bf16 %v1560_v10, %v1559_v16 }
 0x278   : > { %v1529_v40 = vpop.permute.xlu1 %1528  ;;  %v1570_v34 = vsel %vm1554_vm2, %v1474_v53, 0.0 }
 0x279   : > { %vm1551_vm9 = vcmp.eq.s32.totalorder %v1529_v40, 1  ;;  %2397 = vmatprep.mubr.msk.bf16.mxu0 %vm1611_vm7, %v1573_v2  ;;  %v1788_v46 = vpop.permute.xlu0 %1787 }
 0x27a   : > { %v1567_v58 = vsel %vm1551_vm9, %v1471_v21, 0.0 }
 0x27b   : > { %v1577_v0 = vpack.c.bf16 %v1568_v8, %v1567_v58 }
 0x27c   : > { %v1511_v36 = vpop.permute.xlu1 %1510 }
 0x27d   : > { %vm1545_vm0 = vcmp.eq.s32.totalorder %v1511_v36, 1  ;;  %2405 = vmatprep.mubr.msk.bf16.mxu1 %vm1611_vm7, %v1577_v0  ;;  %v1792_v36 = vpop.permute.xlu0 %1791 }
 0x27e   : > { %v1561_v14 = vsel %vm1545_vm0, %v1465_v50, 0.0 }
 0x27f   : > { %v1574_v60 = vpack.c.bf16 %v1562_v48, %v1561_v14 }
 0x280   : > { %v1535_v20 = vpop.permute.xlu1 %1534 }
 0x281   : > { %vm1553_vm11 = vcmp.eq.s32.totalorder %v1535_v20, 1  ;;  %2398 = vmatmul.mubr.msk.bf16.gmra.mxu0 %vm1611_vm7, %v1574_v60 }
 0x282   : > { %v1569_v63 = vsel %vm1553_vm11, %v1473_v61, 0.0 }
 0x283   : > { %v1578_v47 = vpack.c.bf16 %v1570_v34, %v1569_v63 }
 0x284   : > { %v1766_v29 = vpop.permute.xlu1 %1765 }
 0x285   : > { %2406 = vmatmul.mubr.msk.bf16.gmra.mxu1 %vm1611_vm7, %v1578_v47 }
 0x288   : > { %v1770_v41 = vpop.permute.xlu1 %1769 }
 0x28c   : > { %v1774_v18 = vpop.permute.xlu1 %1773 }
 0x290   : > { %v1778_v42 = vpop.permute.xlu1 %1777 }
 0x294   : > { %v1782_v6 = vpop.permute.xlu1 %1781 }
 0x298   : > { %v1786_v57 = vpop.permute.xlu1 %1785 }
 0x29c   : > { %v4365_v1 = vpop.permute.xlu1 %1789 }
 0x2a0   : > { %v1794_v17 = vpop.permute.xlu1 %1793 }
 0x2a4   : > { %v4372_v33 = vpop.permute.xlu1 %1851 }
 0x323   : > { %v4367_v51 = vpop.f32.mrf.mxu0 }
 0x324   : > { %v1815_v4 = vadd.f32 %v4367_v51, %v1770_v41 }
 0x325   : > { %v4370_v28 = vpop.f32.mrf.mxu0 }
 0x326   : > { %v1831_v54 = vmax.f32 %v1815_v4, 0.0  ;;  %v1813_v22 = vadd.f32 %v1766_v29, %v4370_v28 }
 0x327   : > { %v4374_v9 = vpop.f32.mrf.mxu0  ;;  %v4376_v35 = vpop.f32.mrf.mxu1 }
 0x328   : > { %v1816_v19 = vadd.f32 %v4374_v9, %v1772_v15  ;;  %v1823_v55 = vadd.f32 %v4376_v35, %v1786_v57  ;;  %v1856_v23 = vmul.f32 %v4372_v33, %v1831_v54  ;;  %v1829_v7 = vmax.f32 %v1813_v22, 0.0 }
 0x329   : > { %v4382_v59 = vpop.f32.mrf.mxu1  ;;  %v4384_v12 = vpop.f32.mrf.mxu0 }
 0x32a   : > { %v1832_v43 = vmax.f32 %v1816_v19, 0.0  ;;  %v1839_v62 = vmax.f32 %v1823_v55, 0.0  ;;  %1890 = vrot.lane.b32.xlu0 %v1856_v23, %s2650_s24  ;;  %v1821_v38 = vadd.f32 %v1782_v6, %v4382_v59  ;;  %v1814_v32 = vadd.f32 %v1768_v30, %v4384_v12  ;;  %v1796_v6 = vpop.permute.xlu0 %1795 }
 0x32b   : > { %v4387_v5 = vpop.f32.mrf.mxu1  ;;  %v1854_v2 = vmul.f32 %v4372_v33, %v1829_v7 }
 0x32c   : > { %v1857_v44 = vmul.f32 %v4372_v33, %v1832_v43  ;;  %v1864_v49 = vmul.f32 %v4372_v33, %v1839_v62  ;;  %v1824_v26 = vadd.f32 %v4387_v5, %v1788_v46  ;;  %v1837_v10 = vmax.f32 %v1821_v38, 0.0 }
 0x32d   : > { %v4394_v27 = vpop.f32.mrf.mxu1  ;;  %v1830_v52 = vmax.f32 %v1814_v32, 0.0 }
 0x32e   : > { %1906 = vrot.lane.b32.xlu0 %v1864_v49, %s2650_s24  ;;  %1892 = vrot.lane.b32.xlu1 %v1857_v44, %s2650_s24  ;;  %v1840_v16 = vmax.f32 %v1824_v26, 0.0  ;;  %v1822_v13 = vadd.f32 %v1784_v31, %v4394_v27  ;;  %v1862_v21 = vmul.f32 %v4372_v33, %v1837_v10 }
 0x32f   : > { %v1855_v40 = vmul.f32 %v4372_v33, %v1830_v52 }
 0x330   : > { %v1865_v25 = vmul.f32 %v4372_v33, %v1840_v16  ;;  %v1838_v11 = vmax.f32 %v1822_v13, 0.0 }
 0x332   : > { %1886 = vrot.lane.b32.xlu0 %v1854_v2, %s2650_s24  ;;  %1908 = vrot.lane.b32.xlu1 %v1865_v25, %s2650_s24  ;;  %v1863_v24 = vmul.f32 %v4372_v33, %v1838_v11 }
 0x336   : > { %1902 = vrot.lane.b32.xlu0 %v1862_v21, %s2650_s24  ;;  %1888 = vrot.lane.b32.xlu1 %v1855_v40, %s2650_s24 }
 0x33a   : > { %1904 = vrot.lane.b32.xlu1 %v1863_v24, %s2650_s24 }
 0x341   : > { %v4409_v58 = vpop.f32.mrf.mxu0 }
 0x342   : > { %v1819_v8 = vadd.f32 %v4409_v58, %v1778_v42 }
 0x343   : > { %v4412_v0 = vpop.f32.mrf.mxu0 }
 0x344   : > { %v1835_v56 = vmax.f32 %v1819_v8, 0.0  ;;  %v1817_v50 = vadd.f32 %v1774_v18, %v4412_v0 }
 0x345   : > { %v4415_v39 = vpop.f32.mrf.mxu0  ;;  %v4417_v48 = vpop.f32.mrf.mxu1 }
 0x346   : > { %v1860_v45 = vmul.f32 %v4372_v33, %v1835_v56  ;;  %v1833_v53 = vmax.f32 %v1817_v50, 0.0  ;;  %v1820_v14 = vadd.f32 %v4415_v39, %v1780_v3  ;;  %v1827_v34 = vadd.f32 %v4417_v48, %v1794_v17 }
 0x347   : > { %v4421_v60 = vpop.f32.mrf.mxu0  ;;  %v4423_v61 = vpop.f32.mrf.mxu1 }
 0x348   : > { %v1836_v20 = vmax.f32 %v1820_v14, 0.0  ;;  %v1818_v63 = vadd.f32 %v1776_v37, %v4421_v60  ;;  %1898 = vrot.lane.b32.xlu0 %v1860_v45, %s2650_s24  ;;  %v1825_v47 = vadd.f32 %v4365_v1, %v4423_v61  ;;  %v1858_v41 = vmul.f32 %v4372_v33, %v1833_v53 }
 0x349   : > { %v4430_v29 = vpop.f32.mrf.mxu1  ;;  %v1843_v37 = vmax.f32 %v1827_v34, 0.0 }
 0x34a   : > { %v1861_v18 = vmul.f32 %v4372_v33, %v1836_v20  ;;  %v1834_v42 = vmax.f32 %v1818_v63, 0.0  ;;  %v1841_v30 = vmax.f32 %v1825_v47, 0.0  ;;  %v1828_v17 = vadd.f32 %v4430_v29, %v1796_v6  ;;  %v4466_v47 = vld [vmem:[#allocation3] ss:$0 sm:$0xff] }
 0x34b   : > { %v4434_v15 = vpop.f32.mrf.mxu1  ;;  %v1868_v31 = vmul.f32 %v4372_v33, %v1843_v37 }
 0x34c   : > { %v1826_v57 = vadd.f32 %v1792_v36, %v4434_v15  ;;  %1894 = vrot.lane.b32.xlu0 %v1858_v41, %s2650_s24  ;;  %1900 = vrot.lane.b32.xlu1 %v1861_v18, %s2650_s24  ;;  %v1859_v1 = vmul.f32 %v4372_v33, %v1834_v42  ;;  %v1866_v3 = vmul.f32 %v4372_v33, %v1841_v30  ;;  %v1844_v54 = vmax.f32 %v1828_v17, 0.0 }
 0x34e   : > { %v1842_v4 = vmax.f32 %v1826_v57, 0.0  ;;  %v1869_v19 = vmul.f32 %v4372_v33, %v1844_v54 }
 0x350   : > { %1910 = vrot.lane.b32.xlu0 %v1866_v3, %s2650_s24  ;;  %1896 = vrot.lane.b32.xlu1 %v1859_v1, %s2650_s24  ;;  %v1867_v22 = vmul.f32 %v4372_v33, %v1842_v4 }
 0x354   : > { %1914 = vrot.lane.b32.xlu0 %v1868_v31, %s2650_s24  ;;  %1912 = vrot.lane.b32.xlu1 %v1867_v22, %s2650_s24 }
 0x358   : > { %1916 = vrot.lane.b32.xlu1 %v1869_v19, %s2650_s24 }
 0x39c   : > { %v1891_v55 = vpop.permute.xlu0 %1890 }
 0x39d   : > { %v1941_v23 = vsel %vm1934_vm13, %v1891_v55, 0.0 }
 0x39e   : > { %1942 = vadd.xlane.f32.xlu0 %v1941_v23 }
 0x3a0   : > { %v1893_v43 = vpop.permute.xlu1 %1892  ;;  %v1907_v62 = vpop.permute.xlu0 %1906 }
 0x3a1   : > { %v1965_v46 = vsel %vm1934_vm13, %v1907_v62, 0.0  ;;  %v1944_v33 = vsel %vm1934_vm13, %v1893_v43, 0.0 }
 0x3a2   : > { %1966 = vadd.xlane.f32.xlu1 %v1965_v46 }
 0x3a4   : > { %v1887_v7 = vpop.permute.xlu0 %1886  ;;  %v1909_v44 = vpop.permute.xlu1 %1908 }
 0x3a5   : > { %v1935_v49 = vsel %vm1934_vm13, %v1887_v7, 0.0  ;;  %v1968_v16 = vsel %vm1934_vm13, %v1909_v44, 0.0 }
 0x3a6   : > { %1936 = vadd.xlane.f32.xlu0 %v1935_v49 }
 0x3a8   : > { %v1903_v38 = vpop.permute.xlu0 %1902  ;;  %v1889_v32 = vpop.permute.xlu1 %1888 }
 0x3a9   : > { %v1959_v26 = vsel %vm1934_vm13, %v1903_v38, 0.0  ;;  %v1938_v10 = vsel %vm1934_vm13, %v1889_v32, 0.0 }
 0x3aa   : > { %1945 = vadd.xlane.f32.xlu0 %v1944_v33  ;;  %1960 = vadd.xlane.f32.xlu1 %v1959_v26 }
 0x3ac   : > { %v1905_v2 = vpop.permute.xlu1 %1904 }
 0x3ad   : > { %v1962_v52 = vsel %vm1934_vm13, %v1905_v2, 0.0 }
 0x3ae   : > { %1969 = vadd.xlane.f32.xlu0 %v1968_v16  ;;  %1939 = vadd.xlane.f32.xlu1 %v1938_v10 }
 0x3b2   : > { %1963 = vadd.xlane.f32.xlu0 %v1962_v52 }
 0x3ba   : > { %v1899_v25 = vpop.permute.xlu0 %1898 }
 0x3bb   : > { %v1953_v13 = vsel %vm1934_vm13, %v1899_v25, 0.0 }
 0x3bc   : > { %1954 = vadd.xlane.f32.xlu1 %v1953_v13 }
 0x3be   : > { %v1901_v21 = vpop.permute.xlu1 %1900  ;;  %v1895_v40 = vpop.permute.xlu0 %1894 }
 0x3bf   : > { %v1956_v11 = vsel %vm1934_vm13, %v1901_v21, 0.0  ;;  %v1947_v24 = vsel %vm1934_vm13, %v1895_v40, 0.0 }
 0x3c0   : > { %1957 = vadd.xlane.f32.xlu0 %v1956_v11  ;;  %1948 = vadd.xlane.f32.xlu1 %v1947_v24 }
 0x3c2   : > { %v1897_v8 = vpop.permute.xlu1 %1896  ;;  %v1911_v56 = vpop.permute.xlu0 %1910 }
 0x3c3   : > { %v1950_v50 = vsel %vm1934_vm13, %v1897_v8, 0.0  ;;  %v1971_v36 = vsel %vm1934_vm13, %v1911_v56, 0.0 }
 0x3c4   : > { %1951 = vadd.xlane.f32.xlu0 %v1950_v50  ;;  %1972 = vadd.xlane.f32.xlu1 %v1971_v36 }
 0x3c6   : > { %v1913_v45 = vpop.permute.xlu1 %1912  ;;  %v1915_v53 = vpop.permute.xlu0 %1914 }
 0x3c7   : > { %v1974_v14 = vsel %vm1934_vm13, %v1913_v45, 0.0  ;;  %v1977_v20 = vsel %vm1934_vm13, %v1915_v53, 0.0 }
 0x3c8   : > { %1975 = vadd.xlane.f32.xlu0 %v1974_v14  ;;  %1978 = vadd.xlane.f32.xlu1 %v1977_v20 }
 0x3ca   : > { %v1917_v63 = vpop.permute.xlu1 %1916 }
 0x3cb   : > { %v1980_v34 = vsel %vm1934_vm13, %v1917_v63, 0.0 }
 0x3cc   : > { %1981 = vadd.xlane.f32.xlu0 %v1980_v34 }
 0x427   : > { %v1943_v41 = vpop.xlane.xlu0 %1942 }
 0x428   : > { %v1992_v18 = vadd.f32 %v4466_v47, %v1943_v41 }
 0x42a   : > { %v2008_v42 = vsub.f32 0.0, %v1992_v18 }
 0x42b   : > { %v1967_v30 = vpop.xlane.xlu1 %1966 }
 0x42c   : > { %v2026_v6 = vmul.f32 1.442695, %v2008_v42  ;;  %v2000_v57 = vadd.f32 %v4466_v47, %v1967_v30 }
 0x42e   : > { %2505 = vpow2.f32 %v2026_v6  ;;  %v2016_v37 = vsub.f32 0.0, %v2000_v57 }
 0x42f   : > { %v1937_v1 = vpop.xlane.xlu0 %1936 }
 0x430   : > { %v2042_v3 = vmul.f32 1.442695, %v2016_v37  ;;  %v1990_v17 = vadd.f32 %v4466_v47, %v1937_v1 }
 0x432   : > { %2507 = vpow2.f32 %v2042_v3  ;;  %v2006_v4 = vsub.f32 0.0, %v1990_v17 }
 0x433   : > { %v1961_v31 = vpop.xlane.xlu1 %1960  ;;  %v1946_v54 = vpop.xlane.xlu0 %1945 }
 0x434   : > { %v2022_v22 = vmul.f32 1.442695, %v2006_v4  ;;  %v1998_v19 = vadd.f32 %v4466_v47, %v1961_v31  ;;  %v1993_v55 = vadd.f32 %v4466_v47, %v1946_v54 }
 0x436   : > { %2509 = vpow2.f32 %v2022_v22  ;;  %v2014_v23 = vsub.f32 0.0, %v1998_v19  ;;  %v2009_v43 = vsub.f32 0.0, %v1993_v55 }
 0x437   : > { %v1940_v62 = vpop.xlane.xlu1 %1939  ;;  %v1970_v46 = vpop.xlane.xlu0 %1969 }
 0x438   : > { %v2038_v7 = vmul.f32 1.442695, %v2014_v23  ;;  %v2028_v44 = vmul.f32 1.442695, %v2009_v43  ;;  %v1991_v49 = vadd.f32 %v4466_v47, %v1940_v62  ;;  %v2001_v38 = vadd.f32 %v4466_v47, %v1970_v46 }
 0x43a   : > { %2511 = vpow2.f32 %v2038_v7  ;;  %v2007_v33 = vsub.f32 0.0, %v1991_v49  ;;  %v2017_v32 = vsub.f32 0.0, %v2001_v38 }
 0x43b   : > { %v2506_v26 = vpop.eup %2505  ;;  %2513 = vpow2.f32 %v2028_v44  ;;  %v1964_v16 = vpop.xlane.xlu0 %1963 }
 0x43c   : > { %v2056_v10 = vadd.f32 1.0, %v2506_v26  ;;  %v2024_v2 = vmul.f32 1.442695, %v2007_v33  ;;  %v2044_v52 = vmul.f32 1.442695, %v2017_v32  ;;  %v1999_v25 = vadd.f32 %v4466_v47, %v1964_v16 }
 0x43e   : > { %2515 = vrcp.f32 %v2056_v10  ;;  %v2015_v13 = vsub.f32 0.0, %v1999_v25 }
 0x43f   : > { %v2508_v21 = vpop.eup %2507  ;;  %2517 = vpow2.f32 %v2024_v2 }
 0x440   : > { %v2064_v40 = vadd.f32 1.0, %v2508_v21  ;;  %2519 = vpow2.f32 %v2044_v52  ;;  %v2040_v11 = vmul.f32 1.442695, %v2015_v13 }
 0x442   : > { %2521 = vrcp.f32 %v2064_v40 }
 0x443   : > { %v2510_v24 = vpop.eup %2509  ;;  %2523 = vpow2.f32 %v2040_v11 }
 0x444   : > { %v2054_v8 = vadd.f32 1.0, %v2510_v24 }
 0x445   : > { %v1955_v56 = vpop.xlane.xlu1 %1954 }
 0x446   : > { %2525 = vrcp.f32 %v2054_v8  ;;  %v1996_v50 = vadd.f32 %v4466_v47, %v1955_v56 }
 0x447   : > { %v2512_v36 = vpop.eup %2511 }
 0x448   : > { %v2514_v45 = vpop.eup %2513  ;;  %v2062_v53 = vadd.f32 1.0, %v2512_v36  ;;  %v2012_v14 = vsub.f32 0.0, %v1996_v50 }
 0x449   : > { %v2057_v20 = vadd.f32 1.0, %v2514_v45  ;;  %v1949_v63 = vpop.xlane.xlu1 %1948  ;;  %v1958_v34 = vpop.xlane.xlu0 %1957 }
 0x44a   : > { %2527 = vrcp.f32 %v2062_v53  ;;  %v2034_v41 = vmul.f32 1.442695, %v2012_v14  ;;  %v1994_v18 = vadd.f32 %v4466_v47, %v1949_v63  ;;  %v1997_v42 = vadd.f32 %v4466_v47, %v1958_v34 }
 0x44b   : > { %v2516_v30 = vpop.eup %2515  ;;  %2529 = vrcp.f32 %v2057_v20 }
 0x44c   : > { %v2518_v6 = vpop.eup %2517  ;;  %2531 = vpow2.f32 %v2034_v41  ;;  %v2010_v57 = vsub.f32 0.0, %v1994_v18  ;;  %v2013_v37 = vsub.f32 0.0, %v1997_v42  ;;  %2122 = vrot.lane.b32.xlu1 %v2516_v30, %s2650_s24 }
 0x44d   : > { %v2520_v1 = vpop.eup %2519  ;;  %v2055_v3 = vadd.f32 1.0, %v2518_v6  ;;  %v1973_v17 = vpop.xlane.xlu1 %1972 }
 0x44e   : > { %v1952_v4 = vpop.xlane.xlu0 %1951  ;;  %v2065_v31 = vadd.f32 1.0, %v2520_v1  ;;  %v2030_v54 = vmul.f32 1.442695, %v2010_v57  ;;  %v2036_v22 = vmul.f32 1.442695, %v2013_v37  ;;  %v2002_v19 = vadd.f32 %v4466_v47, %v1973_v17 }
 0x44f   : > { %v2522_v55 = vpop.eup %2521  ;;  %2533 = vrcp.f32 %v2055_v3  ;;  %v1995_v23 = vadd.f32 %v4466_v47, %v1952_v4 }
 0x450   : > { %v2524_v43 = vpop.eup %2523  ;;  %2535 = vrcp.f32 %v2065_v31  ;;  %v2018_v62 = vsub.f32 0.0, %v2002_v19  ;;  %2138 = vrot.lane.b32.xlu0 %v2522_v55, %s2650_s24 }
 0x451   : > { %v2063_v46 = vadd.f32 1.0, %v2524_v43  ;;  %2537 = vpow2.f32 %v2030_v54  ;;  %v2011_v7 = vsub.f32 0.0, %v1995_v23  ;;  %v1979_v44 = vpop.xlane.xlu1 %1978 }
 0x452   : > { %v1976_v49 = vpop.xlane.xlu0 %1975  ;;  %2539 = vpow2.f32 %v2036_v22  ;;  %v2046_v38 = vmul.f32 1.442695, %v2018_v62  ;;  %v2004_v33 = vadd.f32 %v4466_v47, %v1979_v44 }
 0x453   : > { %v2003_v32 = vadd.f32 %v4466_v47, %v1976_v49  ;;  %v2526_v26 = vpop.eup %2525  ;;  %2541 = vrcp.f32 %v2063_v46  ;;  %v2032_v16 = vmul.f32 1.442695, %v2011_v7 }
 0x454   : > { %2543 = vpow2.f32 %v2046_v38  ;;  %v2020_v10 = vsub.f32 0.0, %v2004_v33  ;;  %2118 = vrot.lane.b32.xlu1 %v2526_v26, %s2650_s24 }
 0x455   : > { %v2019_v2 = vsub.f32 0.0, %v2003_v32  ;;  %2545 = vpow2.f32 %v2032_v16 }
 0x456   : > { %v1982_v52 = vpop.xlane.xlu0 %1981  ;;  %v2050_v25 = vmul.f32 1.442695, %v2020_v10 }
 0x457   : > { %v2048_v13 = vmul.f32 1.442695, %v2019_v2  ;;  %v2005_v21 = vadd.f32 %v4466_v47, %v1982_v52  ;;  %v2528_v40 = vpop.eup %2527 }
 0x458   : > { %v2530_v11 = vpop.eup %2529  ;;  %2547 = vpow2.f32 %v2050_v25  ;;  %2134 = vrot.lane.b32.xlu0 %v2528_v40, %s2650_s24 }
 0x459   : > { %v2021_v24 = vsub.f32 0.0, %v2005_v21  ;;  %v2532_v8 = vpop.eup %2531  ;;  %2549 = vpow2.f32 %v2048_v13  ;;  %2124 = vrot.lane.b32.xlu1 %v2530_v11, %s2650_s24 }
 0x45a   : > { %v2060_v56 = vadd.f32 1.0, %v2532_v8 }
 0x45b   : > { %v2052_v50 = vmul.f32 1.442695, %v2021_v24 }
 0x45c   : > { %v2534_v36 = vpop.eup %2533  ;;  %2551 = vrcp.f32 %v2060_v56 }
 0x45d   : > { %v2536_v45 = vpop.eup %2535  ;;  %2553 = vpow2.f32 %v2052_v50  ;;  %2120 = vrot.lane.b32.xlu0 %v2534_v36, %s2650_s24 }
 0x45e   : > { %v2538_v53 = vpop.eup %2537  ;;  %2140 = vrot.lane.b32.xlu1 %v2536_v45, %s2650_s24 }
 0x45f   : > { %v2540_v47 = vpop.eup %2539  ;;  %v2058_v14 = vadd.f32 1.0, %v2538_v53 }
 0x460   : > { %v2542_v20 = vpop.eup %2541  ;;  %v2061_v63 = vadd.f32 1.0, %v2540_v47 }
 0x461   : > { %v2544_v34 = vpop.eup %2543  ;;  %2555 = vrcp.f32 %v2058_v14 }
 0x462   : > { %v2546_v41 = vpop.eup %2545  ;;  %2557 = vrcp.f32 %v2061_v63  ;;  %v2066_v18 = vadd.f32 1.0, %v2544_v34  ;;  %2136 = vrot.lane.b32.xlu1 %v2542_v20, %s2650_s24 }
 0x463   : > { %v2059_v42 = vadd.f32 1.0, %v2546_v41 }
 0x464   : > { %2559 = vrcp.f32 %v2066_v18 }
 0x465   : > { %v2548_v30 = vpop.eup %2547  ;;  %2561 = vrcp.f32 %v2059_v42 }
 0x466   : > { %v2550_v6 = vpop.eup %2549  ;;  %v2068_v57 = vadd.f32 1.0, %v2548_v30 }
 0x467   : > { %v2067_v37 = vadd.f32 1.0, %v2550_v6 }
 0x468   : > { %2563 = vrcp.f32 %v2068_v57 }
 0x469   : > { %v2552_v1 = vpop.eup %2551  ;;  %2565 = vrcp.f32 %v2067_v37 }
 0x46a   : > { %v2554_v3 = vpop.eup %2553  ;;  %2130 = vrot.lane.b32.xlu0 %v2552_v1, %s2650_s24 }
 0x46b   : > { %v2069_v17 = vadd.f32 1.0, %v2554_v3 }
 0x46d   : > { %2567 = vrcp.f32 %v2069_v17 }
 0x46e   : > { %v2556_v4 = vpop.eup %2555 }
 0x46f   : > { %v2558_v31 = vpop.eup %2557  ;;  %2126 = vrot.lane.b32.xlu0 %v2556_v4, %s2650_s24 }
 0x470   : > { %2132 = vrot.lane.b32.xlu1 %v2558_v31, %s2650_s24 }
 0x471   : > { %v2560_v54 = vpop.eup %2559 }
 0x472   : > { %v2562_v22 = vpop.eup %2561 }
 0x473   : > { %2142 = vrot.lane.b32.xlu0 %v2560_v54, %s2650_s24 }
 0x474   : > { %2128 = vrot.lane.b32.xlu1 %v2562_v22, %s2650_s24 }
 0x475   : > { %v2564_v19 = vpop.eup %2563 }
 0x476   : > { %v2566_v55 = vpop.eup %2565 }
 0x477   : > { %2146 = vrot.lane.b32.xlu0 %v2564_v19, %s2650_s24 }
 0x478   : > { %2144 = vrot.lane.b32.xlu1 %v2566_v55, %s2650_s24 }
 0x47a   : > { %v2568_v23 = vpop.eup %2567 }
 0x47c   : > { %2148 = vrot.lane.b32.xlu1 %v2568_v23, %s2650_s24 }
 0x4be   : > { %v2123_v43 = vpop.permute.xlu1 %2122 }
 0x4bf   : > { %v2168_v62 = vsel %vm1611_vm7, %v4367_v51, %v2123_v43 }
 0x4c0   : > { %v2185_v46 = vsel %vm2182_vm14, %v2168_v62, 0.0 }
 0x4c1   : > { %2201 = vst [vmem:[%s4506_s17 + $0x10] sm:$0xff] %v2185_v46 }
 0x4c2   : > { %v2139_v7 = vpop.permute.xlu0 %2138 }
 0x4c3   : > { %v2176_v44 = vsel %vm1611_vm7, %v4376_v35, %v2139_v7 }
 0x4c4   : > { %v2193_v49 = vsel %vm2182_vm14, %v2176_v44, 0.0 }
 0x4c5   : > { %2209 = vst [vmem:[%s4506_s17 + $0x50] sm:$0xff] %v2193_v49 }
 0x4c6   : > { %v2119_v38 = vpop.permute.xlu1 %2118 }
 0x4c7   : > { %v2166_v51 = vsel %vm1611_vm7, %v4370_v28, %v2119_v38 }
 0x4c8   : > { %v2183_v33 = vsel %vm2182_vm14, %v2166_v51, 0.0 }
 0x4c9   : > { %2199 = vst [vmem:[%s4506_s17] sm:$0xff] %v2183_v33 }
 0x4ca   : > { %v2135_v32 = vpop.permute.xlu0 %2134 }
 0x4cb   : > { %v2125_v26 = vpop.permute.xlu1 %2124  ;;  %v2174_v16 = vsel %vm1611_vm7, %v4382_v59, %v2135_v32 }
 0x4cc   : > { %v2169_v35 = vsel %vm1611_vm7, %v4374_v9, %v2125_v26  ;;  %v2191_v10 = vsel %vm2182_vm14, %v2174_v16, 0.0 }
 0x4cd   : > { %v2186_v2 = vsel %vm2182_vm14, %v2169_v35, 0.0  ;;  %2207 = vst [vmem:[%s4506_s17 + $0x40] sm:$0xff] %v2191_v10 }
 0x4ce   : > { %2202 = vst [vmem:[%s4506_s17 + $0x18] sm:$0xff] %v2186_v2 }
 0x4cf   : > { %v2121_v28 = vpop.permute.xlu0 %2120 }
 0x4d0   : > { %v2141_v52 = vpop.permute.xlu1 %2140  ;;  %v2167_v25 = vsel %vm1611_vm7, %v4384_v12, %v2121_v28 }
 0x4d1   : > { %v2177_v13 = vsel %vm1611_vm7, %v4387_v5, %v2141_v52  ;;  %v2184_v59 = vsel %vm2182_vm14, %v2167_v25, 0.0 }
 0x4d2   : > { %v2194_v9 = vsel %vm2182_vm14, %v2177_v13, 0.0  ;;  %2200 = vst [vmem:[%s4506_s17 + $0x8] sm:$0xff] %v2184_v59 }
 0x4d3   : > { %2210 = vst [vmem:[%s4506_s17 + $0x58] sm:$0xff] %v2194_v9 }
 0x4d4   : > { %v2137_v21 = vpop.permute.xlu1 %2136 }
 0x4d5   : > { %v2175_v40 = vsel %vm1611_vm7, %v4394_v27, %v2137_v21 }
 0x4d6   : > { %v2192_v11 = vsel %vm2182_vm14, %v2175_v40, 0.0 }
 0x4d7   : > { %2208 = vst [vmem:[%s4506_s17 + $0x48] sm:$0xff] %v2192_v11 }
 0x4dc   : > { %v2131_v24 = vpop.permute.xlu0 %2130 }
 0x4dd   : > { %v2172_v12 = vsel %vm1611_vm7, %v4409_v58, %v2131_v24 }
 0x4de   : > { %v2189_v5 = vsel %vm2182_vm14, %v2172_v12, 0.0 }
 0x4df   : > { %2205 = vst [vmem:[%s4506_s17 + $0x30] sm:$0xff] %v2189_v5 }
 0x4e1   : > { %v2127_v8 = vpop.permute.xlu0 %2126 }
 0x4e2   : > { %v2133_v56 = vpop.permute.xlu1 %2132  ;;  %v2170_v50 = vsel %vm1611_vm7, %v4412_v0, %v2127_v8 }
 0x4e3   : > { %v2173_v27 = vsel %vm1611_vm7, %v4415_v39, %v2133_v56  ;;  %v2187_v36 = vsel %vm2182_vm14, %v2170_v50, 0.0 }
 0x4e4   : > { %v2190_v45 = vsel %vm2182_vm14, %v2173_v27, 0.0  ;;  %2203 = vst [vmem:[%s4506_s17 + $0x20] sm:$0xff] %v2187_v36 }
 0x4e5   : > { %2206 = vst [vmem:[%s4506_s17 + $0x38] sm:$0xff] %v2190_v45  ;;  %v2143_v58 = vpop.permute.xlu0 %2142 }
 0x4e6   : > { %v2129_v53 = vpop.permute.xlu1 %2128  ;;  %v2178_v47 = vsel %vm1611_vm7, %v4423_v61, %v2143_v58 }
 0x4e7   : > { %v2171_v0 = vsel %vm1611_vm7, %v4421_v60, %v2129_v53  ;;  %v2195_v39 = vsel %vm2182_vm14, %v2178_v47, 0.0 }
 0x4e8   : > { %v2188_v14 = vsel %vm2182_vm14, %v2171_v0, 0.0  ;;  %2211 = vst [vmem:[%s4506_s17 + $0x60] sm:$0xff] %v2195_v39 }
 0x4e9   : > { %2204 = vst [vmem:[%s4506_s17 + $0x28] sm:$0xff] %v2188_v14  ;;  %v2147_v20 = vpop.permute.xlu0 %2146 }
 0x4ea   : > { %v2145_v63 = vpop.permute.xlu1 %2144  ;;  %v2180_v34 = vsel %vm1611_vm7, %v4417_v48, %v2147_v20 }
 0x4eb   : > { %v2179_v41 = vsel %vm1611_vm7, %v4434_v15, %v2145_v63  ;;  %v2197_v61 = vsel %vm2182_vm14, %v2180_v34, 0.0 }
 0x4ec   : > { %v2196_v60 = vsel %vm2182_vm14, %v2179_v41, 0.0  ;;  %2213 = vst [vmem:[%s4506_s17 + $0x70] sm:$0xff] %v2197_v61 }
 0x4ed   : > { %2212 = vst [vmem:[%s4506_s17 + $0x68] sm:$0xff] %v2196_v60 }
 0x4ee   : > { %v2149_v18 = vpop.permute.xlu1 %2148 }
 0x4ef   : > { %v2181_v48 = vsel %vm1611_vm7, %v4430_v29, %v2149_v18 }
 0x4f0   : > { %v2198_v15 = vsel %vm2182_vm14, %v2181_v48, 0.0 }
 0x4f1   : > { %2214 = vst [vmem:[%s4506_s17 + $0x78] sm:$0xff] %v2198_v15 }
 0x4f2   : > { %2582 = shalt.err (!%p2579_p5)
}
 0x4f3   : > { %s2583_s10 = scalar_lea.hbm %s4570_s26, 2048  ;;  %s2587_s19 = scalar_lea.hbm %s4634_s9, 4096 }
 0x4f4   : > { %p2584_p6 = scmp.ne.s32.totalorder %s4570_s26, %s2583_s10  ;;  %p2588_p10 = scmp.lt.s32.totalorder %s4570_s26, %s4634_s9 }
 0x4f5   : > { %p2589_p11 = scmp.lt.s32.totalorder %s2587_s19, %s2583_s10 }
 0x4f6   : > { %p2585_p7 = pnand %p2584_p6, %p2747_p4 }
 0x4f7   : > { %p2590_p12 = por %p2589_p11, %p2588_p10 }
 0x4f8   : > { %p2586_p9 = pneg %p2585_p7 }
 0x4fa   : > { %p2591_p13 = pnand %p2590_p12, %p2586_p9 }
 0x4fc   : > { %2594 = shalt.err (!%p2591_p13)
}
 0x4fd   : > { %s2652_s27 = smov 128   ;;  %s2653_s28 = smov 8  }
 0x4fe   : > { %2417 = dma.vmem_to_hbm [thread:$0]  (%p2747_p4), %s4572_s21, 2048, %s4570_s26, %s4580_s14, %s2652_s27, %s2652_s27, %s2653_s28  }
 0x4ff PF: > { %p2423_p0 = scmp.ge.s32.totalorder %s2645_s16, 2  ;;  %s2244_s29 = sand.u32 1, %s2625_s11  }
 0x500   : > { %s2245_s30 = scalar_lea.sflag [#allocation5], %s2244_s29 }
 0x501   : > { %p2420_p1 = pnand %p2423_p0, %p2754_p8 }
 0x503   : > { %p2421_p2 = pneg %p2420_p1 }
 0x505   : > { %2620 = dma.done.wait (%p2421_p2), %s2245_s30, 2048  }
 0x506   : > { %2622 = vsyncadd (%p2421_p2), %s2245_s30, 4294965248  ;;  %s24_s16 = sadd.s32 1, %s2645_s16   ;;  %s4827_s11 = smov %s2629_s12 }
 0x507   : > { %p21_p3 = scmp.ge.s32.totalorder %s24_s16, 4   ;;  %s4828_s12 = smov %s2633_s13 }
 0x508   : > { %s4829_s13 = smov %s2760_s23  ;;  %s4830_s14 = smov %s2641_s15 }
 0x509   : > { %s4831_s15 = smov %s4833_s18  ;;  %23 = sbr.rel (!%p21_p3) target bundleno = 7 (0x7), region = 109 }
 0x50e   :  { %2250 = vsyncpa [#allocation5], 1 }
 0x50f   :  { %2252 = vsyncpa [#allocation5 + $0x1], 1 }

</bundles_post_ra>
